<compile_context>
chip_gen: v7x
topology: tpu7x:2x2x1
jax: 0.10.0
libtpu: 0.0.40
codegen_flags: <defaults>
</compile_context>

<pallas_src>
import jax
import jax.numpy as jnp
from jax.experimental import pallas as pl
from jax.experimental.pallas import tpu as pltpu

K = 3  # conv2 kernel size (3x3x3, padding=0 -> "valid": spatial shrinks by 2)


def _pick_nb(n):
    """Largest per-step batch that still leaves >=2 grid steps (v7x: 2 TCs)."""
    for nb in range(n // 2, 0, -1):
        if n % nb == 0:
            return nb
    return 1


def bt_residual_block(x, params, nb=None):
    """x: (N, C, D, H, W) float32 (NCDHW). Returns (N, C, D-2, H-2, W-2)."""
    w1t, b1, w2t, b2, w3t, b3 = params
    N, C, D, H, W = x.shape
    Cout = w1t.shape[0]
    S = D * H * W
    Do, Ho, Wo = D - (K - 1), H - (K - 1), W - (K - 1)

    if nb is None:
        nb = _pick_nb(N)
    assert N % nb == 0, (N, nb)
    L = nb * S                      # lanes per grid step (multiple of 128)
    n_steps = N // nb

    # Pre-stack the 3x3x3 weight for the fused matmul: (27, Cout, Cin) ->
    # (Cout, 27*Cin), lane-dense, matching the window stacking order below.
    w2s = w2t.transpose(1, 0, 2).reshape(Cout, K * K * K * C)

    def kernel(x_ref, w1_ref, b1_ref, w2_ref, b2_ref, w3_ref, b3_ref,
               o_ref, win_ref):
        x2d = x_ref[...]                                  # (C, L), lane-dense

        # TODO(synk): per perf review, casting matmul operands to bf16 (keeping
        # preferred_element_type=f32 and f32 epilogues) would roughly triple
        # MXU throughput on v6e/v7x, but changes numerics vs. the f32 PyTorch
        # module; kept f32 pending precision-policy agreement.

        # ---- conv1: 1x1x1 conv + ReLU (one MXU matmul over channels) ----
        h1 = jnp.dot(w1_ref[...], x2d, preferred_element_type=jnp.float32)
        h1 = jnp.maximum(h1 + b1_ref[...], 0.0)

        # ---- conv2: 3x3x3 valid conv + ReLU as ONE fused matmul ----
        # Materialize the 27 shifted windows into VMEM scratch (27*C, L):
        # rows [tap*C:(tap+1)*C] hold h1 shifted by that tap's flat offset.
        for kd in range(K):
            for kh in range(K):
                for kw in range(K):
                    off = kd * H * W + kh * W + kw
                    tap = (kd * K + kh) * K + kw
                    win = h1 if off == 0 else pltpu.roll(h1, shift=L - off,
                                                         axis=1)
                    win_ref[tap * C:(tap + 1) * C, :] = win
        # Single deep-contraction matmul: (Cout, 27*Cin) x (27*Cin, L).
        h2 = jnp.dot(w2_ref[...], win_ref[...],
                     preferred_element_type=jnp.float32)
        h2 = jnp.maximum(h2 + b2_ref[...], 0.0)

        # ---- conv3: 1x1x1 conv + ReLU ----
        h3 = jnp.dot(w3_ref[...], h2, preferred_element_type=jnp.float32)
        h3 = jnp.maximum(h3 + b3_ref[...], 0.0)

        # ---- residual add ----
        # TODO(synk): the PyTorch module computes `x + x_out` even though conv2
        # (kernel 3, padding=0) shrinks spatial dims by 2, so the literal
        # forward would raise; we center-crop x by one voxel (flat offset
        # H*W + W + 1) so the residual add is defined.
        x_crop = pltpu.roll(x2d, shift=L - (H * W + W + 1), axis=1)
        o_ref[...] = (x_crop + h3).astype(o_ref.dtype)

    def full_spec(a):
        nd = a.ndim
        return pl.BlockSpec(a.shape, lambda g, _nd=nd: (0,) * _nd)

    # Lane-dense slab: (N, C, S) -> (C, N*S); each grid step takes nb*S lanes.
    x_flat = x.reshape(N, C, S).transpose(1, 0, 2).reshape(C, N * S)

    out_flat = pl.pallas_call(
        kernel,
        out_shape=jax.ShapeDtypeStruct((Cout, N * S), x.dtype),
        grid_spec=pltpu.PrefetchScalarGridSpec(
            num_scalar_prefetch=0,
            grid=(n_steps,),
            in_specs=[
                pl.BlockSpec((C, L), lambda g: (0, g)),
                full_spec(w1t), full_spec(b1),
                full_spec(w2s), full_spec(b2),
                full_spec(w3t), full_spec(b3),
            ],
            out_specs=pl.BlockSpec((Cout, L), lambda g: (0, g)),
            scratch_shapes=[pltpu.VMEM((K * K * K * C, L), jnp.float32)],
        ),
        # Grid steps are independent -> lets v7x run them on its 2 TCs;
        # neutral on single-TC v5e/v6e.
        compiler_params=pltpu.CompilerParams(
            dimension_semantics=("parallel",)),
    )(x_flat, w1t, b1, w2s, b2, w3t, b3)

    # Back to NCDHW and crop away the lanes whose window crossed a boundary.
    # TODO(synk): when this block is stacked in a network, keep the flat
    # lane-dense (C, N*S) layout between blocks and crop only once at the end.
    out = out_flat.reshape(Cout, N, S).transpose(1, 0, 2)
    return out.reshape(N, Cout, D, H, W)[:, :, :Do, :Ho, :Wo]


def ref_forward(x, params):
    """Pure-JAX reference (same math, NCDHW, f32)."""
    w1t, b1, w2t, b2, w3t, b3 = params
    relu = lambda t: jnp.maximum(t, 0.0)
    N, C, D, H, W = x.shape
    Do, Ho, Wo = D - 2, H - 2, W - 2
    bshape = (1, -1, 1, 1, 1)
    h1 = relu(jnp.einsum('oc,ncdhw->nodhw', w1t, x) + b1.reshape(bshape))
    acc = jnp.zeros((N, w2t.shape[1], Do, Ho, Wo), jnp.float32)
    for kd in range(3):
        for kh in range(3):
            for kw in range(3):
                tap = (kd * 3 + kh) * 3 + kw
                acc = acc + jnp.einsum(
                    'oc,ncdhw->nodhw', w2t[tap],
                    h1[:, :, kd:kd + Do, kh:kh + Ho, kw:kw + Wo])
    h2 = relu(acc + b2.reshape(bshape))
    h3 = relu(jnp.einsum('oc,ncdhw->nodhw', w3t, h2) + b3.reshape(bshape))
    return x[:, :, 1:1 + Do, 1:1 + Ho, 1:1 + Wo] + h3


if __name__ == "__main__":
    N, C, D, H, W = 4, 8, 8, 8, 8   # in_channels == out_channels == 8
    key = jax.random.PRNGKey(0)
    kx, k1, k2, k3, k4, k5, k6 = jax.random.split(key, 7)

    x = jax.random.normal(kx, (N, C, D, H, W), jnp.float32)

    w1t = jax.random.normal(k1, (C, C), jnp.float32) * 0.3
    b1 = jax.random.normal(k2, (C, 1), jnp.float32) * 0.1
    w2t = jax.random.normal(k3, (K * K * K, C, C), jnp.float32) * 0.1
    b2 = jax.random.normal(k4, (C, 1), jnp.float32) * 0.1
    w3t = jax.random.normal(k5, (C, C), jnp.float32) * 0.3
    b3 = jax.random.normal(k6, (C, 1), jnp.float32) * 0.1
    params = (w1t, b1, w2t, b2, w3t, b3)

    out = jax.block_until_ready(bt_residual_block(x, params))

    expected = ref_forward(x, params)
    assert out.shape == (N, C, D - 2, H - 2, W - 2), out.shape
    assert jnp.allclose(out, expected, atol=1e-4, rtol=1e-4), (
        float(jnp.max(jnp.abs(out - expected))))

    print("KERNEL_OK")
</pallas_src>

<mosaic_0001>
module attributes {stable_mosaic.version = 11 : i64} {
  func.func @kernel(%arg0: i32, %arg1: memref<8x1024xf32, #tpu.memory_space<vmem>>, %arg2: memref<8x8xf32, #tpu.memory_space<vmem>>, %arg3: memref<8x1xf32, #tpu.memory_space<vmem>>, %arg4: memref<8x216xf32, #tpu.memory_space<vmem>>, %arg5: memref<8x1xf32, #tpu.memory_space<vmem>>, %arg6: memref<8x8xf32, #tpu.memory_space<vmem>>, %arg7: memref<8x1xf32, #tpu.memory_space<vmem>>, %arg8: memref<8x1024xf32, #tpu.memory_space<vmem>>, %arg9: memref<216x1024xf32, #tpu.memory_space<vmem>>) attributes {dimension_semantics = [#tpu.dimension_semantics<parallel>], iteration_bounds = array<i64: 2>, scalar_prefetch = 0 : i64, scratch_operands = 1 : i64, tpu.core_type = #tpu.core_type<tc>, window_params = [{transform_indices = @transform_0, window_bounds = array<i64: 8, 1024>}, {pipeline_mode = #tpu.pipeline_mode<synchronous>, transform_indices = @transform_1, window_bounds = array<i64: 8, 8>}, {pipeline_mode = #tpu.pipeline_mode<synchronous>, transform_indices = @transform_2, window_bounds = array<i64: 8, 1>}, {pipeline_mode = #tpu.pipeline_mode<synchronous>, transform_indices = @transform_3, window_bounds = array<i64: 8, 216>}, {pipeline_mode = #tpu.pipeline_mode<synchronous>, transform_indices = @transform_4, window_bounds = array<i64: 8, 1>}, {pipeline_mode = #tpu.pipeline_mode<synchronous>, transform_indices = @transform_5, window_bounds = array<i64: 8, 8>}, {pipeline_mode = #tpu.pipeline_mode<synchronous>, transform_indices = @transform_6, window_bounds = array<i64: 8, 1>}, {transform_indices = @transform_7, window_bounds = array<i64: 8, 1024>}]} {
    %c0 = arith.constant 0 : index
    %c0_0 = arith.constant 0 : index
    %0 = vector.load %arg1[%c0, %c0_0] : memref<8x1024xf32, #tpu.memory_space<vmem>>, vector<8x1024xf32>
    %c0_1 = arith.constant 0 : index
    %c0_2 = arith.constant 0 : index
    %1 = vector.load %arg2[%c0_1, %c0_2] : memref<8x8xf32, #tpu.memory_space<vmem>>, vector<8x8xf32>
    %cst = arith.constant dense<0.000000e+00> : vector<8x1024xf32>
    %2 = tpu.matmul %1, %0, %cst {dimension_numbers = #tpu.dot_dimension_numbers<[1], [0], [0], [1], [0, 0, 1, 1], [], []>} : vector<8x8xf32>, vector<8x1024xf32>, vector<8x1024xf32> -> vector<8x1024xf32>
    %c0_3 = arith.constant 0 : index
    %c0_4 = arith.constant 0 : index
    %3 = vector.load %arg3[%c0_3, %c0_4] : memref<8x1xf32, #tpu.memory_space<vmem>>, vector<8x1xf32>
    %4 = vector.broadcast %3 : vector<8x1xf32> to vector<8x1024xf32>
    %5 = arith.addf %2, %4 : vector<8x1024xf32>
    %cst_5 = arith.constant 0.000000e+00 : f32
    %6 = vector.broadcast %cst_5 : f32 to vector<8x1024xf32>
    %7 = arith.maximumf %5, %6 : vector<8x1024xf32>
    %c0_6 = arith.constant 0 : index
    %c0_7 = arith.constant 0 : index
    %8 = vector.load %arg9[%c0_6, %c0_7] : memref<216x1024xf32, #tpu.memory_space<vmem>>, vector<8x1024xf32>
    tpu.vector_store %arg9[%c0_6, %c0_7], %7 {strides = array<i32>} : memref<216x1024xf32, #tpu.memory_space<vmem>>, vector<8x1024xf32>,
    %c1023_i32 = arith.constant 1023 : i32
    %9 = tpu.dynamic_rotate %7 by %c1023_i32 dim 1 : vector<8x1024xf32>, i32 -> vector<8x1024xf32>
    %c8 = arith.constant 8 : index
    %c0_8 = arith.constant 0 : index
    %10 = vector.load %arg9[%c8, %c0_8] : memref<216x1024xf32, #tpu.memory_space<vmem>>, vector<8x1024xf32>
    tpu.vector_store %arg9[%c8, %c0_8], %9 {strides = array<i32>} : memref<216x1024xf32, #tpu.memory_space<vmem>>, vector<8x1024xf32>,
    %c1022_i32 = arith.constant 1022 : i32
    %11 = tpu.dynamic_rotate %7 by %c1022_i32 dim 1 : vector<8x1024xf32>, i32 -> vector<8x1024xf32>
    %c16 = arith.constant 16 : index
    %c0_9 = arith.constant 0 : index
    %12 = vector.load %arg9[%c16, %c0_9] : memref<216x1024xf32, #tpu.memory_space<vmem>>, vector<8x1024xf32>
    tpu.vector_store %arg9[%c16, %c0_9], %11 {strides = array<i32>} : memref<216x1024xf32, #tpu.memory_space<vmem>>, vector<8x1024xf32>,
    %c1016_i32 = arith.constant 1016 : i32
    %13 = tpu.dynamic_rotate %7 by %c1016_i32 dim 1 : vector<8x1024xf32>, i32 -> vector<8x1024xf32>
    %c24 = arith.constant 24 : index
    %c0_10 = arith.constant 0 : index
    %14 = vector.load %arg9[%c24, %c0_10] : memref<216x1024xf32, #tpu.memory_space<vmem>>, vector<8x1024xf32>
    tpu.vector_store %arg9[%c24, %c0_10], %13 {strides = array<i32>} : memref<216x1024xf32, #tpu.memory_space<vmem>>, vector<8x1024xf32>,
    %c1015_i32 = arith.constant 1015 : i32
    %15 = tpu.dynamic_rotate %7 by %c1015_i32 dim 1 : vector<8x1024xf32>, i32 -> vector<8x1024xf32>
    %c32 = arith.constant 32 : index
    %c0_11 = arith.constant 0 : index
    %16 = vector.load %arg9[%c32, %c0_11] : memref<216x1024xf32, #tpu.memory_space<vmem>>, vector<8x1024xf32>
    tpu.vector_store %arg9[%c32, %c0_11], %15 {strides = array<i32>} : memref<216x1024xf32, #tpu.memory_space<vmem>>, vector<8x1024xf32>,
    %c1014_i32 = arith.constant 1014 : i32
    %17 = tpu.dynamic_rotate %7 by %c1014_i32 dim 1 : vector<8x1024xf32>, i32 -> vector<8x1024xf32>
    %c40 = arith.constant 40 : index
    %c0_12 = arith.constant 0 : index
    %18 = vector.load %arg9[%c40, %c0_12] : memref<216x1024xf32, #tpu.memory_space<vmem>>, vector<8x1024xf32>
    tpu.vector_store %arg9[%c40, %c0_12], %17 {strides = array<i32>} : memref<216x1024xf32, #tpu.memory_space<vmem>>, vector<8x1024xf32>,
    %c1008_i32 = arith.constant 1008 : i32
    %19 = tpu.dynamic_rotate %7 by %c1008_i32 dim 1 : vector<8x1024xf32>, i32 -> vector<8x1024xf32>
    %c48 = arith.constant 48 : index
    %c0_13 = arith.constant 0 : index
    %20 = vector.load %arg9[%c48, %c0_13] : memref<216x1024xf32, #tpu.memory_space<vmem>>, vector<8x1024xf32>
    tpu.vector_store %arg9[%c48, %c0_13], %19 {strides = array<i32>} : memref<216x1024xf32, #tpu.memory_space<vmem>>, vector<8x1024xf32>,
    %c1007_i32 = arith.constant 1007 : i32
    %21 = tpu.dynamic_rotate %7 by %c1007_i32 dim 1 : vector<8x1024xf32>, i32 -> vector<8x1024xf32>
    %c56 = arith.constant 56 : index
    %c0_14 = arith.constant 0 : index
    %22 = vector.load %arg9[%c56, %c0_14] : memref<216x1024xf32, #tpu.memory_space<vmem>>, vector<8x1024xf32>
    tpu.vector_store %arg9[%c56, %c0_14], %21 {strides = array<i32>} : memref<216x1024xf32, #tpu.memory_space<vmem>>, vector<8x1024xf32>,
    %c1006_i32 = arith.constant 1006 : i32
    %23 = tpu.dynamic_rotate %7 by %c1006_i32 dim 1 : vector<8x1024xf32>, i32 -> vector<8x1024xf32>
    %c64 = arith.constant 64 : index
    %c0_15 = arith.constant 0 : index
    %24 = vector.load %arg9[%c64, %c0_15] : memref<216x1024xf32, #tpu.memory_space<vmem>>, vector<8x1024xf32>
    tpu.vector_store %arg9[%c64, %c0_15], %23 {strides = array<i32>} : memref<216x1024xf32, #tpu.memory_space<vmem>>, vector<8x1024xf32>,
    %c960_i32 = arith.constant 960 : i32
    %25 = tpu.dynamic_rotate %7 by %c960_i32 dim 1 : vector<8x1024xf32>, i32 -> vector<8x1024xf32>
    %c72 = arith.constant 72 : index
    %c0_16 = arith.constant 0 : index
    %26 = vector.load %arg9[%c72, %c0_16] : memref<216x1024xf32, #tpu.memory_space<vmem>>, vector<8x1024xf32>
    tpu.vector_store %arg9[%c72, %c0_16], %25 {strides = array<i32>} : memref<216x1024xf32, #tpu.memory_space<vmem>>, vector<8x1024xf32>,
    %c959_i32 = arith.constant 959 : i32
    %27 = tpu.dynamic_rotate %7 by %c959_i32 dim 1 : vector<8x1024xf32>, i32 -> vector<8x1024xf32>
    %c80 = arith.constant 80 : index
    %c0_17 = arith.constant 0 : index
    %28 = vector.load %arg9[%c80, %c0_17] : memref<216x1024xf32, #tpu.memory_space<vmem>>, vector<8x1024xf32>
    tpu.vector_store %arg9[%c80, %c0_17], %27 {strides = array<i32>} : memref<216x1024xf32, #tpu.memory_space<vmem>>, vector<8x1024xf32>,
    %c958_i32 = arith.constant 958 : i32
    %29 = tpu.dynamic_rotate %7 by %c958_i32 dim 1 : vector<8x1024xf32>, i32 -> vector<8x1024xf32>
    %c88 = arith.constant 88 : index
    %c0_18 = arith.constant 0 : index
    %30 = vector.load %arg9[%c88, %c0_18] : memref<216x1024xf32, #tpu.memory_space<vmem>>, vector<8x1024xf32>
    tpu.vector_store %arg9[%c88, %c0_18], %29 {strides = array<i32>} : memref<216x1024xf32, #tpu.memory_space<vmem>>, vector<8x1024xf32>,
    %c952_i32 = arith.constant 952 : i32
    %31 = tpu.dynamic_rotate %7 by %c952_i32 dim 1 : vector<8x1024xf32>, i32 -> vector<8x1024xf32>
    %c96 = arith.constant 96 : index
    %c0_19 = arith.constant 0 : index
    %32 = vector.load %arg9[%c96, %c0_19] : memref<216x1024xf32, #tpu.memory_space<vmem>>, vector<8x1024xf32>
    tpu.vector_store %arg9[%c96, %c0_19], %31 {strides = array<i32>} : memref<216x1024xf32, #tpu.memory_space<vmem>>, vector<8x1024xf32>,
    %c951_i32 = arith.constant 951 : i32
    %33 = tpu.dynamic_rotate %7 by %c951_i32 dim 1 : vector<8x1024xf32>, i32 -> vector<8x1024xf32>
    %c104 = arith.constant 104 : index
    %c0_20 = arith.constant 0 : index
    %34 = vector.load %arg9[%c104, %c0_20] : memref<216x1024xf32, #tpu.memory_space<vmem>>, vector<8x1024xf32>
    tpu.vector_store %arg9[%c104, %c0_20], %33 {strides = array<i32>} : memref<216x1024xf32, #tpu.memory_space<vmem>>, vector<8x1024xf32>,
    %c950_i32 = arith.constant 950 : i32
    %35 = tpu.dynamic_rotate %7 by %c950_i32 dim 1 : vector<8x1024xf32>, i32 -> vector<8x1024xf32>
    %c112 = arith.constant 112 : index
    %c0_21 = arith.constant 0 : index
    %36 = vector.load %arg9[%c112, %c0_21] : memref<216x1024xf32, #tpu.memory_space<vmem>>, vector<8x1024xf32>
    tpu.vector_store %arg9[%c112, %c0_21], %35 {strides = array<i32>} : memref<216x1024xf32, #tpu.memory_space<vmem>>, vector<8x1024xf32>,
    %c944_i32 = arith.constant 944 : i32
    %37 = tpu.dynamic_rotate %7 by %c944_i32 dim 1 : vector<8x1024xf32>, i32 -> vector<8x1024xf32>
    %c120 = arith.constant 120 : index
    %c0_22 = arith.constant 0 : index
    %38 = vector.load %arg9[%c120, %c0_22] : memref<216x1024xf32, #tpu.memory_space<vmem>>, vector<8x1024xf32>
    tpu.vector_store %arg9[%c120, %c0_22], %37 {strides = array<i32>} : memref<216x1024xf32, #tpu.memory_space<vmem>>, vector<8x1024xf32>,
    %c943_i32 = arith.constant 943 : i32
    %39 = tpu.dynamic_rotate %7 by %c943_i32 dim 1 : vector<8x1024xf32>, i32 -> vector<8x1024xf32>
    %c128 = arith.constant 128 : index
    %c0_23 = arith.constant 0 : index
    %40 = vector.load %arg9[%c128, %c0_23] : memref<216x1024xf32, #tpu.memory_space<vmem>>, vector<8x1024xf32>
    tpu.vector_store %arg9[%c128, %c0_23], %39 {strides = array<i32>} : memref<216x1024xf32, #tpu.memory_space<vmem>>, vector<8x1024xf32>,
    %c942_i32 = arith.constant 942 : i32
    %41 = tpu.dynamic_rotate %7 by %c942_i32 dim 1 : vector<8x1024xf32>, i32 -> vector<8x1024xf32>
    %c136 = arith.constant 136 : index
    %c0_24 = arith.constant 0 : index
    %42 = vector.load %arg9[%c136, %c0_24] : memref<216x1024xf32, #tpu.memory_space<vmem>>, vector<8x1024xf32>
    tpu.vector_store %arg9[%c136, %c0_24], %41 {strides = array<i32>} : memref<216x1024xf32, #tpu.memory_space<vmem>>, vector<8x1024xf32>,
    %c896_i32 = arith.constant 896 : i32
    %43 = tpu.dynamic_rotate %7 by %c896_i32 dim 1 : vector<8x1024xf32>, i32 -> vector<8x1024xf32>
    %c144 = arith.constant 144 : index
    %c0_25 = arith.constant 0 : index
    %44 = vector.load %arg9[%c144, %c0_25] : memref<216x1024xf32, #tpu.memory_space<vmem>>, vector<8x1024xf32>
    tpu.vector_store %arg9[%c144, %c0_25], %43 {strides = array<i32>} : memref<216x1024xf32, #tpu.memory_space<vmem>>, vector<8x1024xf32>,
    %c895_i32 = arith.constant 895 : i32
    %45 = tpu.dynamic_rotate %7 by %c895_i32 dim 1 : vector<8x1024xf32>, i32 -> vector<8x1024xf32>
    %c152 = arith.constant 152 : index
    %c0_26 = arith.constant 0 : index
    %46 = vector.load %arg9[%c152, %c0_26] : memref<216x1024xf32, #tpu.memory_space<vmem>>, vector<8x1024xf32>
    tpu.vector_store %arg9[%c152, %c0_26], %45 {strides = array<i32>} : memref<216x1024xf32, #tpu.memory_space<vmem>>, vector<8x1024xf32>,
    %c894_i32 = arith.constant 894 : i32
    %47 = tpu.dynamic_rotate %7 by %c894_i32 dim 1 : vector<8x1024xf32>, i32 -> vector<8x1024xf32>
    %c160 = arith.constant 160 : index
    %c0_27 = arith.constant 0 : index
    %48 = vector.load %arg9[%c160, %c0_27] : memref<216x1024xf32, #tpu.memory_space<vmem>>, vector<8x1024xf32>
    tpu.vector_store %arg9[%c160, %c0_27], %47 {strides = array<i32>} : memref<216x1024xf32, #tpu.memory_space<vmem>>, vector<8x1024xf32>,
    %c888_i32 = arith.constant 888 : i32
    %49 = tpu.dynamic_rotate %7 by %c888_i32 dim 1 : vector<8x1024xf32>, i32 -> vector<8x1024xf32>
    %c168 = arith.constant 168 : index
    %c0_28 = arith.constant 0 : index
    %50 = vector.load %arg9[%c168, %c0_28] : memref<216x1024xf32, #tpu.memory_space<vmem>>, vector<8x1024xf32>
    tpu.vector_store %arg9[%c168, %c0_28], %49 {strides = array<i32>} : memref<216x1024xf32, #tpu.memory_space<vmem>>, vector<8x1024xf32>,
    %c887_i32 = arith.constant 887 : i32
    %51 = tpu.dynamic_rotate %7 by %c887_i32 dim 1 : vector<8x1024xf32>, i32 -> vector<8x1024xf32>
    %c176 = arith.constant 176 : index
    %c0_29 = arith.constant 0 : index
    %52 = vector.load %arg9[%c176, %c0_29] : memref<216x1024xf32, #tpu.memory_space<vmem>>, vector<8x1024xf32>
    tpu.vector_store %arg9[%c176, %c0_29], %51 {strides = array<i32>} : memref<216x1024xf32, #tpu.memory_space<vmem>>, vector<8x1024xf32>,
    %c886_i32 = arith.constant 886 : i32
    %53 = tpu.dynamic_rotate %7 by %c886_i32 dim 1 : vector<8x1024xf32>, i32 -> vector<8x1024xf32>
    %c184 = arith.constant 184 : index
    %c0_30 = arith.constant 0 : index
    %54 = vector.load %arg9[%c184, %c0_30] : memref<216x1024xf32, #tpu.memory_space<vmem>>, vector<8x1024xf32>
    tpu.vector_store %arg9[%c184, %c0_30], %53 {strides = array<i32>} : memref<216x1024xf32, #tpu.memory_space<vmem>>, vector<8x1024xf32>,
    %c880_i32 = arith.constant 880 : i32
    %55 = tpu.dynamic_rotate %7 by %c880_i32 dim 1 : vector<8x1024xf32>, i32 -> vector<8x1024xf32>
    %c192 = arith.constant 192 : index
    %c0_31 = arith.constant 0 : index
    %56 = vector.load %arg9[%c192, %c0_31] : memref<216x1024xf32, #tpu.memory_space<vmem>>, vector<8x1024xf32>
    tpu.vector_store %arg9[%c192, %c0_31], %55 {strides = array<i32>} : memref<216x1024xf32, #tpu.memory_space<vmem>>, vector<8x1024xf32>,
    %c879_i32 = arith.constant 879 : i32
    %57 = tpu.dynamic_rotate %7 by %c879_i32 dim 1 : vector<8x1024xf32>, i32 -> vector<8x1024xf32>
    %c200 = arith.constant 200 : index
    %c0_32 = arith.constant 0 : index
    %58 = vector.load %arg9[%c200, %c0_32] : memref<216x1024xf32, #tpu.memory_space<vmem>>, vector<8x1024xf32>
    tpu.vector_store %arg9[%c200, %c0_32], %57 {strides = array<i32>} : memref<216x1024xf32, #tpu.memory_space<vmem>>, vector<8x1024xf32>,
    %c878_i32 = arith.constant 878 : i32
    %59 = tpu.dynamic_rotate %7 by %c878_i32 dim 1 : vector<8x1024xf32>, i32 -> vector<8x1024xf32>
    %c208 = arith.constant 208 : index
    %c0_33 = arith.constant 0 : index
    %60 = vector.load %arg9[%c208, %c0_33] : memref<216x1024xf32, #tpu.memory_space<vmem>>, vector<8x1024xf32>
    tpu.vector_store %arg9[%c208, %c0_33], %59 {strides = array<i32>} : memref<216x1024xf32, #tpu.memory_space<vmem>>, vector<8x1024xf32>,
    %c0_34 = arith.constant 0 : index
    %c0_35 = arith.constant 0 : index
    %61 = vector.load %arg4[%c0_34, %c0_35] : memref<8x216xf32, #tpu.memory_space<vmem>>, vector<8x216xf32>
    %c0_36 = arith.constant 0 : index
    %c0_37 = arith.constant 0 : index
    %62 = vector.load %arg9[%c0_36, %c0_37] : memref<216x1024xf32, #tpu.memory_space<vmem>>, vector<216x1024xf32>
    %cst_38 = arith.constant dense<0.000000e+00> : vector<8x1024xf32>
    %63 = tpu.matmul %61, %62, %cst_38 {dimension_numbers = #tpu.dot_dimension_numbers<[1], [0], [0], [1], [0, 0, 1, 1], [], []>} : vector<8x216xf32>, vector<216x1024xf32>, vector<8x1024xf32> -> vector<8x1024xf32>
    %c0_39 = arith.constant 0 : index
    %c0_40 = arith.constant 0 : index
    %64 = vector.load %arg5[%c0_39, %c0_40] : memref<8x1xf32, #tpu.memory_space<vmem>>, vector<8x1xf32>
    %65 = vector.broadcast %64 : vector<8x1xf32> to vector<8x1024xf32>
    %66 = arith.addf %63, %65 : vector<8x1024xf32>
    %cst_41 = arith.constant 0.000000e+00 : f32
    %67 = vector.broadcast %cst_41 : f32 to vector<8x1024xf32>
    %68 = arith.maximumf %66, %67 : vector<8x1024xf32>
    %c0_42 = arith.constant 0 : index
    %c0_43 = arith.constant 0 : index
    %69 = vector.load %arg6[%c0_42, %c0_43] : memref<8x8xf32, #tpu.memory_space<vmem>>, vector<8x8xf32>
    %cst_44 = arith.constant dense<0.000000e+00> : vector<8x1024xf32>
    %70 = tpu.matmul %69, %68, %cst_44 {dimension_numbers = #tpu.dot_dimension_numbers<[1], [0], [0], [1], [0, 0, 1, 1], [], []>} : vector<8x8xf32>, vector<8x1024xf32>, vector<8x1024xf32> -> vector<8x1024xf32>
    %c0_45 = arith.constant 0 : index
    %c0_46 = arith.constant 0 : index
    %71 = vector.load %arg7[%c0_45, %c0_46] : memref<8x1xf32, #tpu.memory_space<vmem>>, vector<8x1xf32>
    %72 = vector.broadcast %71 : vector<8x1xf32> to vector<8x1024xf32>
    %73 = arith.addf %70, %72 : vector<8x1024xf32>
    %cst_47 = arith.constant 0.000000e+00 : f32
    %74 = vector.broadcast %cst_47 : f32 to vector<8x1024xf32>
    %75 = arith.maximumf %73, %74 : vector<8x1024xf32>
    %c951_i32_48 = arith.constant 951 : i32
    %76 = tpu.dynamic_rotate %0 by %c951_i32_48 dim 1 : vector<8x1024xf32>, i32 -> vector<8x1024xf32>
    %77 = arith.addf %76, %75 : vector<8x1024xf32>
    %c0_49 = arith.constant 0 : index
    %c0_50 = arith.constant 0 : index
    %78 = vector.load %arg8[%c0_49, %c0_50] : memref<8x1024xf32, #tpu.memory_space<vmem>>, vector<8x1024xf32>
    tpu.vector_store %arg8[%c0_49, %c0_50], %77 {strides = array<i32>} : memref<8x1024xf32, #tpu.memory_space<vmem>>, vector<8x1024xf32>,
    return
  }
  func.func @transform_0(%arg0: i32) -> (i32, i32) {
    %c0_i32 = arith.constant 0 : i32
    %c0_i32_0 = arith.constant 0 : i32
    return %c0_i32, %arg0 : i32, i32
  }
  func.func @transform_1(%arg0: i32) -> (i32, i32) {
    %c0_i32 = arith.constant 0 : i32
    %c0_i32_0 = arith.constant 0 : i32
    %c0_i32_1 = arith.constant 0 : i32
    return %c0_i32, %c0_i32_0 : i32, i32
  }
  func.func @transform_2(%arg0: i32) -> (i32, i32) {
    %c0_i32 = arith.constant 0 : i32
    %c0_i32_0 = arith.constant 0 : i32
    %c0_i32_1 = arith.constant 0 : i32
    return %c0_i32, %c0_i32_0 : i32, i32
  }
  func.func @transform_3(%arg0: i32) -> (i32, i32) {
    %c0_i32 = arith.constant 0 : i32
    %c0_i32_0 = arith.constant 0 : i32
    %c0_i32_1 = arith.constant 0 : i32
    return %c0_i32, %c0_i32_0 : i32, i32
  }
  func.func @transform_4(%arg0: i32) -> (i32, i32) {
    %c0_i32 = arith.constant 0 : i32
    %c0_i32_0 = arith.constant 0 : i32
    %c0_i32_1 = arith.constant 0 : i32
    return %c0_i32, %c0_i32_0 : i32, i32
  }
  func.func @transform_5(%arg0: i32) -> (i32, i32) {
    %c0_i32 = arith.constant 0 : i32
    %c0_i32_0 = arith.constant 0 : i32
    %c0_i32_1 = arith.constant 0 : i32
    return %c0_i32, %c0_i32_0 : i32, i32
  }
  func.func @transform_6(%arg0: i32) -> (i32, i32) {
    %c0_i32 = arith.constant 0 : i32
    %c0_i32_0 = arith.constant 0 : i32
    %c0_i32_1 = arith.constant 0 : i32
    return %c0_i32, %c0_i32_0 : i32, i32
  }
  func.func @transform_7(%arg0: i32) -> (i32, i32) {
    %c0_i32 = arith.constant 0 : i32
    %c0_i32_0 = arith.constant 0 : i32
    return %c0_i32, %arg0 : i32, i32
  }
}

</mosaic_0001>

<bundles_post_ra>
// kernel: tpu_custom_call.1
= control target key start
LH: loop header
LB: loop body
LE: loop exit
PB: predicated region body
PF: predicated region fallthrough
CT: control target
= control target key end

     0   :  { %12 = vsyncpa [#allocation4], 0  ;;  %s4261_s0 = inlined_call_operand.hbm [shape: f32[8,2048], index: 0, kind: input, shape index: {}]   ;;  %s4262_s1 = inlined_call_operand.vmem [shape: f32[8,8], index: 1, kind: input, shape index: {}]   ;;  %s4263_s2 = inlined_call_operand.vmem [shape: f32[8,1], index: 2, kind: input, shape index: {}]   ;;  %s4264_s3 = inlined_call_operand.vmem [shape: f32[8,216], index: 3, kind: input, shape index: {}]   ;;  %s4265_s4 = inlined_call_operand.vmem [shape: f32[8,1], index: 4, kind: input, shape index: {}]   ;;  %s4266_s5 = inlined_call_operand.vmem [shape: f32[8,8], index: 5, kind: input, shape index: {}]   ;;  %s4267_s6 = inlined_call_operand.vmem [shape: f32[8,1], index: 6, kind: input, shape index: {}]   ;;  %s4268_s7 = inlined_call_operand.hbm [shape: f32[8,2048], index: 7, kind: output, shape index: {}]  }
   0x1   :  { %14 = vsyncpa [#allocation4 + $0x1], 0 }
   0x2   :  { %15 = vsyncpa [#allocation5], 0 }
   0x3   :  { %17 = vsyncpa [#allocation5 + $0x1], 0  ;;  %s2939_s24 = smov 0   ;;  %s2941_s25 = smov 0  }
   0x4   :  { %s2943_s26 = smov 0   ;;  %s2945_s27 = smov 0  }
   0x5 LB: > { %s2960_s28 = sadd.s32 4294967295, %s2876_s27   ;;  %s2198_s29 = sadd.s32 4294967294, %s2876_s27   ;;  %s2876_s27 = sphi %s2945_s27, %s4461_s27   ;;  %s2872_s26 = sphi %s2943_s26, %s4460_s26   ;;  %s2868_s25 = sphi %s2941_s25, %s4459_s25   ;;  %s2864_s24 = sphi %s2939_s24, %s4458_s24  }
   0x6   : > { %s2964_s30 = sadd.s32 1, %s2876_s27   ;;  %s30_s8 = sadd.s32 1, %s2872_s26 }
   0x7   : > { %s27_s9 = ssub.s32 %s2876_s27, %s2964_s30  ;;  %p37_p0 = scmp.ne.s32.totalorder %s2872_s26, %s2868_s25 }
   0x8   : > { %p28_p1 = scmp.eq.s32.totalorder %s27_s9, 0  ;;  %p38_p2 = scmp.eq.s32.totalorder %s2876_s27, 0 }
   0x9   : > { %p43_p3 = scmp.ne.s32.totalorder %s2868_s25, %s2864_s24  ;;  %p44_p4 = scmp.eq.s32.totalorder %s2960_s28, 0 }
   0xa   : > { %s2976_s10 = scalar_select %p28_p1, %s2872_s26, %s30_s8  }
   0xb   : > { %p2978_p5 = por %p38_p2, %p37_p0  ;;  %p2982_p6 = por %p44_p4, %p43_p3 }
   0xc   : > { %p193_p7 = scmp.eq.s32.totalorder %s2960_s28, 1  ;;  %p199_p8 = scmp.eq.s32.totalorder %s2198_s29, 1 }
   0xd   : > { %p2446_p10 = scmp.lt.s32.totalorder %s2876_s27, 2  ;;  %s237_s15 = sand.u32 1, %s2872_s26  }
   0xe   : > { %p2989_p11 = por %p193_p7, %p37_p0  ;;  %p2993_p12 = por %p199_p8, %p43_p3 }
   0xf   : > { %s2224_s16 = sshll.u32 %s2876_s27, 10  ;;  %s2201_s17 = sshll.u32 %s237_s15, 6 }
  0x10   : > { %s4342_s13 = scalar_select %p2989_p11, 1, 0 }
  0x11   : > { %s4343_s14 = scalar_select %p2993_p12, 1, 0 }
  0x12   : > { %s3002_s20 = scalar_lea.hbm %s4261_s0, %s2224_s16  ;;  %s241_s21 = scalar_lea.vmem [#allocation3], %s2201_s17 }
  0x13   : > { %s249_s22 = sshll.u32 %s241_s21, 4  ;;  %p3006_p13 = pnand %p2446_p10, %p2978_p5  ;;  %s3010_s22 = int_to_ptr.vmem [resolvable:$true] %s249_s22 }
  0x14   : > { %s238_s29 = scalar_lea.sflag [#allocation4], %s237_s15  ;;  %s2780_s8 = scalar_lea.hbm %s3002_s20, 1024 }
  0x15   : > { %p2781_p2 = scmp.ne.s32.totalorder %s3002_s20, %s2780_s8  ;;  %p2782_p3 = pneg %p3006_p13 }
  0x16   : > { %s2785_s16 = scalar_lea.hbm %s4261_s0, 2048  ;;  %p2786_p5 = scmp.lt.u32.totalorder %s3002_s20, %s4261_s0 }
  0x17   : > { %p2783_p4 = pnand %p2782_p3, %p2781_p2  ;;  %p2787_p8 = scmp.lt.u32.totalorder %s2785_s16, %s2780_s8 }
  0x18   : > { %p2789_p9 = scmp.lt.u32.totalorder %s2780_s8, %s3002_s20 }
  0x19   : > { %p2784_p7 = pneg %p2783_p4  ;;  %p2788_p10 = por %p2787_p8, %p2786_p5 }
  0x1b   : > { %p2790_p0 = por %p2789_p9, %p2788_p10 }
  0x1d   : > { %p2791_p1 = pnand %p2790_p0, %p2784_p7 }
  0x1f   : > { %2794 = shalt.err (!%p2791_p1)
}
  0x20   : > { %s2795_s15 = scalar_lea.vmem %s3010_s22, 1024  ;;  %s2878_s19 = smov [#allocation3]  }
  0x21   : > { %p2796_p2 = scmp.ne.s32.totalorder %s3010_s22, %s2795_s15  ;;  %s2800_s21 = sshll.u32 %s2878_s19, 4  ;;  %s2801_s21 = int_to_ptr.vmem [resolvable:$false] %s2800_s21 }
  0x22   : > { %s2802_s9 = scalar_lea.vmem %s2801_s21, 2048  ;;  %p2803_p11 = scmp.lt.s32.totalorder %s3010_s22, %s2801_s21 }
  0x23   : > { %p2798_p4 = pnand %p2796_p2, %p2782_p3  ;;  %p2804_p5 = scmp.lt.s32.totalorder %s2802_s9, %s2795_s15 }
  0x25   : > { %p2799_p12 = pneg %p2798_p4  ;;  %p2805_p8 = por %p2804_p5, %p2803_p11 }
  0x27   : > { %p2806_p9 = pnand %p2805_p8, %p2799_p12 }
  0x29   : > { %2809 = shalt.err (!%p2806_p9)
}
  0x2a   : > { %2441 = dma.hbm_to_vmem [thread:$0]  (!%p3006_p13), %s3002_s20, 1024, %s3010_s22, %s238_s29  }
  0x2b   : > { %p4345_p0 = scmp.lt.s32.totalorder %s2876_s27, 3  ;;  %p4346_p1 = scmp.ge.s32.totalorder %s2876_s27, 1 }
  0x2d   : > { %p255_p3 = pnand %p4346_p1, %p4345_p0 }
  0x2f   : > { %258 = sbr.rel (%p255_p3) target bundleno = 1031 (0x407), region = 48 }
  0x36   : > { %s3044_s8 = sand.u32 1, %s2868_s25  }
  0x37   : > { %s4270_s11 = sshll.u32 %s3044_s8, 6  ;;  %s261_s16 = scalar_lea.sflag [#allocation4], %s3044_s8 }
  0x38   : > { %s3050_s23 = scalar_lea.vmem [#allocation3], %s4270_s11 }
  0x39   : > { %2855 = dma.done.wait (%p2982_p6), %s261_s16, 1024  }
  0x3a   : > { %2857 = vsyncadd (%p2982_p6), %s261_s16, 4294966272  ;;  %v4287_v0 = vmov 0.0   ;;  %v2880_v1 = vmov 0   ;;  %v298_v2 = vld [vmem:[%s3050_s23 + $0x8] sm:$0xff]  ;;  %v300_v3 = vld [vmem:[%s3050_s23 + $0x18] sm:$0xff]  ;;  %vm4331_vm0 = vcmask 64512   ;;  %v632_v46 = vlaneseq }
  0x3b   : > { %380 = vmatprep.mubr.f32.mxu0 %v4287_v0  ;;  %451 = vmatprep.mubr.f32.mxu1 %v4287_v0  ;;  %v3061_v4 = vld [vmem:[%s3050_s23] sm:$0xff]  ;;  %v3064_v5 = vld [vmem:[%s3050_s23 + $0x10] sm:$0xff]  ;;  %v302_v7 = vld [vmem:[%s3050_s23 + $0x28] sm:$0xff]  ;;  %s2881_s17 = smov 110   ;;  %s4273_s18 = smov 64   ;;  %vm1475_vm1 = vcmask 719872  }
  0x3c   : > { %2499 = vset.pattern.permute.xlu0 %v2880_v1  ;;  %2775 = vset.pattern.permute.xlu1 %v2880_v1  ;;  %v305_v6 = vld [vmem:[%s4262_s1] sm:$0xff]  ;;  %v304_v8 = vld [vmem:[%s3050_s23 + $0x38] sm:$0xff]  ;;  %v3079_v10 = vld [vmem:[%s3050_s23 + $0x30] sm:$0xff]  ;;  %s4281_s15 = smov 63   ;;  %s4275_s19 = smov 62   ;;  %v3233_v50 = vand.u32 127, %v632_v46 }
  0x3d   : > { %316 = vmatprep.subr.mxu0 %v298_v2  ;;  %387 = vmatprep.subr.mxu1 %v300_v3  ;;  %v3074_v9 = vld [vmem:[%s3050_s23 + $0x20] sm:$0xff]  ;;  %s4279_s21 = smov 56   ;;  %s4277_s9 = smov 55   ;;  %v3211_v43 = vld [vmem:[%s4264_s3 + $0x8] sm:$0xff] }
  0x3e   : > { %317 = vmatpush1.msra.mxu0 %v3061_v4  ;;  %388 = vmatpush1.msra.mxu1 %v3064_v5  ;;  %v306_v11 = vld [vmem:[%s4263_s2] sm:$0xff]  ;;  %s2887_s16 = smov 127   ;;  %s4271_s12 = smov 126   ;;  %4350 = vst [vmem:[#allocation11_spill] sm:$0xff] %v3211_v43  ;;  %vm634_vm2 = vcmp.lt.s32.totalorder %v3233_v50, 127  ;;  %vm667_vm3 = vcmp.lt.s32.totalorder %v3233_v50, 126 }
  0x3f   : > { %2207 = vmatmul.mubr.msk.f32.vlgmr.msra.gmra.mrb[0].mxu0 %vm4331_vm0, %v305_v6  ;;  %2208 = vmatmul.mubr.msk.f32.vlgmr.msra.gmra.mrb[0].mxu1 %vm4331_vm0, %v305_v6  ;;  %s2889_s20 = smov 120   ;;  %s2890_s22 = smov 119   ;;  %vm700_vm4 = vcmp.lt.s32.totalorder %v3233_v50, 120  ;;  %vm733_vm5 = vcmp.lt.s32.totalorder %v3233_v50, 119  ;;  %vm766_vm6 = vcmp.lt.s32.totalorder %v3233_v50, 118  ;;  %vm799_vm7 = vcmp.lt.s32.totalorder %v3233_v50, 112 }
  0x40   : > { %458 = vmatprep.subr.mxu0 %v302_v7  ;;  %529 = vmatprep.subr.mxu1 %v304_v8  ;;  %s2891_s29 = smov 118   ;;  %s2892_s11 = smov 112   ;;  %vm832_vm8 = vcmp.lt.s32.totalorder %v3233_v50, 111  ;;  %vm898_vm9 = vcmp.lt.s32.totalorder %v3233_v50, 64  ;;  %vm865_vm10 = vcmp.lt.s32.totalorder %v3233_v50, 110  ;;  %vm931_vm11 = vcmp.lt.s32.totalorder %v3233_v50, 63 }
  0x41   : > { %459 = vmatpush1.msra.mxu0 %v3074_v9  ;;  %522 = vmatprep.mubr.f32.mxu0 %v4287_v0  ;;  %vm4338_vm12 = vcmp.lt.s32.totalorder %v3233_v50, 62  ;;  %vm997_vm13 = vcmp.lt.s32.totalorder %v3233_v50, 56  ;;  %vm4339_vm14 = vcmp.lt.s32.totalorder %v3233_v50, 55  ;;  %vm1063_vm15 = vcmp.lt.s32.totalorder %v3233_v50, 54  ;;  %p4455_p11 = scmp.ne.s32.totalorder %s4342_s13, 0 }
  0x42   : > { %530 = vmatpush1.msra.mxu1 %v3079_v10  ;;  %593 = vmatprep.mubr.f32.mxu1 %v4287_v0 }
  0x43   : > { %2209 = vmatmul.mubr.msk.f32.vlgmr.msra.gmra.mrb[2].mxu0 %vm4331_vm0, %v305_v6  ;;  %2210 = vmatmul.mubr.msk.f32.vlgmr.msra.gmra.mrb[2].mxu1 %vm4331_vm0, %v305_v6  ;;  %vm1096_vm0 = vcmp.lt.s32.totalorder %v3233_v50, 48 }
  0x44   : > { %309 = vperm.xlu0 %2499, %v306_v11   ;;  %2212 = vmatprep.mubr.msk.f32.mxu1 %vm1475_vm1, %v3211_v43 }
  0x45   : > { %2211 = vmatprep.mubr.msk.f32.mxu0 %vm1475_vm1, %v3211_v43 }
  0xc3   : > { %v3090_v12 = vpop.permute.xlu0 %309 }
 0x112   : > { %v382_v13 = vpop.f32.mrb[0].mxu0  ;;  %v453_v14 = vpop.f32.mrb[0].mxu1 }
 0x113   : > { %v383_v15 = vadd.f32 %v382_v13, %v3090_v12  ;;  %v454_v16 = vadd.f32 %v453_v14, %v3090_v12  ;;  %v384_v17 = vpop.f32.mrb[1].mxu0  ;;  %v455_v18 = vpop.f32.mrb[1].mxu1 }
 0x114   : > { %v385_v25 = vadd.f32 %v384_v17, %v3090_v12  ;;  %v456_v28 = vadd.f32 %v455_v18, %v3090_v12 }
 0x115   : > { %v3094_v19 = vmax.f32 %v383_v15, 0.0  ;;  %v3096_v20 = vmax.f32 %v454_v16, 0.0 }
 0x116   : > { %v524_v21 = vpop.f32.mrb[2].mxu0  ;;  %v3098_v22 = vpop.f32.mrb[2].mxu1  ;;  %v3111_v26 = vmax.f32 %v385_v25, 0.0  ;;  %v3123_v31 = vmax.f32 %v456_v28, 0.0 }
 0x117   : > { %v3100_v23 = vpop.f32.mrb[3].mxu1  ;;  %853 = vrot.lane.b32.xlu1 %v3096_v20, %s2881_s17  ;;  %v526_v24 = vpop.f32.mrb[3].mxu0  ;;  %849 = vrot.lane.b32.xlu0 %v3094_v19, %s2881_s17  ;;  %v525_v27 = vadd.f32 %v524_v21, %v3090_v12  ;;  %v596_v36 = vadd.f32 %v3098_v22, %v3090_v12 }
 0x118   : > { %v2500_v30 = vpack.i.bf16 %v3096_v20, %v3111_v26  ;;  %v527_v33 = vadd.f32 %v526_v24, %v3090_v12  ;;  %v598_v37 = vadd.f32 %v3100_v23, %v3090_v12 }
 0x119   : > { %v3119_v29 = vmax.f32 %v525_v27, 0.0  ;;  %v3189_v38 = vmax.f32 %v596_v36, 0.0 }
 0x11a   : > { %v3160_v34 = vmax.f32 %v527_v33, 0.0  ;;  %v3191_v39 = vmax.f32 %v598_v37, 0.0 }
 0x11b   : > { %882 = vrot.lane.b32.xlu1 %v3094_v19, %s4273_s18  ;;  %915 = vrot.lane.b32.xlu0 %v3094_v19, %s4281_s15  ;;  %v2565_v32 = vpack.i.bf16 %v3119_v29, %v3123_v31 }
 0x11c   : > { %4347 = vst [vmem:[#allocation9_spill] sm:$0xff] %v3160_v34  ;;  %v2630_v35 = vpack.i.bf16 %v3160_v34, %v3094_v19  ;;  %v2695_v40 = vpack.i.bf16 %v3191_v39, %v3189_v38  ;;  %v3231_v49 = vpack.i.bf16 %v3189_v38, %v3160_v34 }
 0x11f   : > { %948 = vrot.lane.b32.xlu1 %v3094_v19, %s4275_s19  ;;  %981 = vrot.lane.b32.xlu0 %v3094_v19, %s4279_s21 }
 0x123   : > { %1014 = vrot.lane.b32.xlu1 %v3094_v19, %s4277_s9  ;;  %2501 = vrot.lane.b32.xlu0 %v2500_v30, %s2887_s16 }
 0x127   : > { %2566 = vrot.lane.b32.xlu1 %v2565_v32, %s2887_s16  ;;  %2506 = vrot.lane.b32.xlu0 %v2500_v30, %s4271_s12 }
 0x12b   : > { %2571 = vrot.lane.b32.xlu1 %v2565_v32, %s4271_s12  ;;  %2511 = vrot.lane.b32.xlu0 %v2500_v30, %s2889_s20  ;;  %s2893_s12 = smov 111  }
 0x12f   : > { %2576 = vrot.lane.b32.xlu1 %v2565_v32, %s2889_s20  ;;  %2516 = vrot.lane.b32.xlu0 %v2500_v30, %s2890_s22 }
 0x133   : > { %2581 = vrot.lane.b32.xlu1 %v2565_v32, %s2890_s22  ;;  %2521 = vrot.lane.b32.xlu0 %v2500_v30, %s2891_s29 }
 0x137   : > { %2586 = vrot.lane.b32.xlu1 %v2565_v32, %s2891_s29  ;;  %2526 = vrot.lane.b32.xlu0 %v2500_v30, %s2892_s11 }
 0x13b   : > { %2591 = vrot.lane.b32.xlu1 %v2565_v32, %s2892_s11  ;;  %2531 = vrot.lane.b32.xlu0 %v2500_v30, %s2893_s12 }
 0x13f   : > { %2596 = vrot.lane.b32.xlu1 %v2565_v32, %s2893_s12  ;;  %851 = vrot.lane.b32.xlu0 %v3111_v26, %s2881_s17 }
 0x143   : > { %857 = vrot.lane.b32.xlu1 %v3119_v29, %s2881_s17  ;;  %855 = vrot.lane.b32.xlu0 %v3123_v31, %s2881_s17 }
 0x147   : > { %2601 = vrot.lane.b32.xlu1 %v2565_v32, %s4273_s18  ;;  %2536 = vrot.lane.b32.xlu0 %v2500_v30, %s4273_s18  ;;  %s2894_s18 = smov 54  }
 0x14b   : > { %2606 = vrot.lane.b32.xlu1 %v2565_v32, %s4281_s15  ;;  %2541 = vrot.lane.b32.xlu0 %v2500_v30, %s4281_s15  ;;  %s4283_s15 = smov 46  }
 0x14f   : > { %2611 = vrot.lane.b32.xlu1 %v2565_v32, %s4275_s19  ;;  %2546 = vrot.lane.b32.xlu0 %v2500_v30, %s4275_s19  ;;  %s4348_s19 = smov 126  }
 0x153   : > { %2616 = vrot.lane.b32.xlu1 %v2565_v32, %s4279_s21  ;;  %2551 = vrot.lane.b32.xlu0 %v2500_v30, %s4279_s21  ;;  %s4285_s21 = smov 47  }
 0x157   : > { %2621 = vrot.lane.b32.xlu1 %v2565_v32, %s4277_s9  ;;  %2556 = vrot.lane.b32.xlu0 %v2500_v30, %s4277_s9  ;;  %s2895_s9 = smov 48  }
 0x15b   : > { %2626 = vrot.lane.b32.xlu1 %v2565_v32, %s2894_s18  ;;  %2561 = vrot.lane.b32.xlu0 %v2500_v30, %s2894_s18 }
 0x15f   : > { %2631 = vrot.lane.b32.xlu1 %v2630_v35, %s2887_s16  ;;  %2636 = vrot.lane.b32.xlu0 %v2630_v35, %s4348_s19 }
 0x163   : > { %2641 = vrot.lane.b32.xlu1 %v2630_v35, %s2889_s20  ;;  %2646 = vrot.lane.b32.xlu0 %v2630_v35, %s2890_s22 }
 0x167   : > { %2651 = vrot.lane.b32.xlu1 %v2630_v35, %s2891_s29  ;;  %2656 = vrot.lane.b32.xlu0 %v2630_v35, %s2892_s11 }
 0x16b   : > { %2666 = vrot.lane.b32.xlu1 %v2630_v35, %s2893_s12  ;;  %2661 = vrot.lane.b32.xlu0 %v2500_v30, %s2895_s9 }
 0x16f   : > { %2671 = vrot.lane.b32.xlu1 %v2565_v32, %s2895_s9  ;;  %1047 = vrot.lane.b32.xlu0 %v3094_v19, %s2894_s18 }
 0x173   : > { %1080 = vrot.lane.b32.xlu1 %v3094_v19, %s2895_s9  ;;  %2676 = vrot.lane.b32.xlu0 %v2500_v30, %s4285_s21 }
 0x177   : > { %2681 = vrot.lane.b32.xlu1 %v2565_v32, %s4285_s21  ;;  %2686 = vrot.lane.b32.xlu0 %v2500_v30, %s4283_s15 }
 0x17b   : > { %2691 = vrot.lane.b32.xlu1 %v2565_v32, %s4283_s15  ;;  %1113 = vrot.lane.b32.xlu0 %v3094_v19, %s4285_s21  ;;  %s4356_s21 = smov 55  }
 0x17f   : > { %1146 = vrot.lane.b32.xlu1 %v3094_v19, %s4283_s15  ;;  %861 = vrot.lane.b32.xlu0 %v3189_v38, %s2881_s17  ;;  %s4352_s15 = smov 64  }
 0x183   : > { %859 = vrot.lane.b32.xlu1 %v3160_v34, %s2881_s17  ;;  %2696 = vrot.lane.b32.xlu0 %v2695_v40, %s2887_s16 }
 0x187   : > { %2706 = vrot.lane.b32.xlu1 %v2695_v40, %s2889_s20  ;;  %2701 = vrot.lane.b32.xlu0 %v2695_v40, %s4348_s19  ;;  %s4355_s19 = smov 56  }
 0x189   : > { %v3204_v41 = vpop.permute.xlu1 %853  ;;  %v3206_v42 = vpop.permute.xlu0 %849 }
 0x18a   : > { %4349 = vst [vmem:[#allocation10_spill] sm:$0xff] %v3206_v42 }
 0x18b   : > { %2716 = vrot.lane.b32.xlu1 %v2695_v40, %s2891_s29  ;;  %2711 = vrot.lane.b32.xlu0 %v2695_v40, %s2890_s22  ;;  %s2898_s22 = smov [#allocation6]  }
 0x18c   : > { %s2814_s29 = sshll.u32 %s2898_s22, 4  ;;  %s2815_s29 = int_to_ptr.vmem [resolvable:$false] %s2814_s29 }
 0x18d   : > { %v3219_v44 = vpop.permute.xlu1 %882  ;;  %v3221_v45 = vpop.permute.xlu0 %915 }
 0x18e   : > { %4351 = vst [vmem:[#allocation12_spill] sm:$0xff] %v3219_v44 }
 0x18f   : > { %2726 = vrot.lane.b32.xlu1 %v2695_v40, %s2893_s12  ;;  %2721 = vrot.lane.b32.xlu0 %v2695_v40, %s2892_s11  ;;  %s4353_s11 = smov 63  }
 0x191   : > { %v3225_v47 = vpop.permute.xlu1 %948  ;;  %v3227_v48 = vpop.permute.xlu0 %981 }
 0x193   : > { %863 = vrot.lane.b32.xlu1 %v3191_v39, %s2881_s17  ;;  %2731 = vrot.lane.b32.xlu0 %v3231_v49, %s4352_s15  ;;  %s4354_s17 = smov 62  }
 0x195   : > { %v3239_v51 = vpop.permute.xlu1 %1014  ;;  %v3241_v52 = vpop.permute.xlu0 %2501 }
 0x196   : > { %v2504_v53 = vunpack.i.h.bf16 %v3241_v52  ;;  %v4305_v54 = vunpack.i.l.bf16 %v3241_v52 }
 0x197   : > { %896 = vrot.lane.b32.xlu1 %v3191_v39, %s4352_s15  ;;  %2736 = vrot.lane.b32.xlu0 %v3231_v49, %s4353_s11  ;;  %s2816_s15 = scalar_lea.vmem %s2815_s29, 2048 }
 0x198   : > { %v640_v55 = vsel %vm634_vm2, %v4305_v54, %v2504_v53 }
 0x199   : > { %v3254_v56 = vpop.permute.xlu1 %2566  ;;  %v3256_v57 = vpop.permute.xlu0 %2506  ;;  %v3259_v58 = vpack.c.bf16 %v640_v55, %v3111_v26 }
 0x19a   : > { %v4289_v59 = vunpack.i.h.bf16 %v3254_v56  ;;  %v2568_v60 = vunpack.i.l.bf16 %v3254_v56  ;;  %v4302_v12 = vunpack.i.h.bf16 %v3256_v57 }
 0x19b   : > { %929 = vrot.lane.b32.xlu1 %v3191_v39, %s4353_s11  ;;  %2741 = vrot.lane.b32.xlu0 %v3231_v49, %s4354_s17 }
 0x19c   : > { %v639_v61 = vsel %vm634_vm2, %v2504_v53, %v2568_v60  ;;  %2227 = vmatprep.subr.bf16.mxu0 %v3259_v58  ;;  %v638_v62 = vsel %vm634_vm2, %v2568_v60, %v4289_v59  ;;  %v1469_v59 = vld [vmem:[%s4265_s4] sm:$0xff] }
 0x19d   : > { %v3275_v63 = vpack.c.bf16 %v639_v61, %v3096_v20  ;;  %v3277_v1 = vpop.permute.xlu1 %2571  ;;  %v3279_v2 = vpop.permute.xlu0 %2511  ;;  %v3282_v3 = vpack.c.bf16 %v638_v62, %v3123_v31 }
 0x19e   : > { %v4299_v6 = vunpack.i.h.bf16 %v3277_v1  ;;  %v2573_v7 = vunpack.i.l.bf16 %v3277_v1  ;;  %v4308_v13 = vunpack.i.h.bf16 %v3279_v2 }
 0x19f   : > { %962 = vrot.lane.b32.xlu1 %v3191_v39, %s4354_s17  ;;  %2279 = vmatprep.subr.bf16.mxu1 %v3282_v3 }
 0x1a0   : > { %2746 = vrot.lane.b32.xlu0 %v3231_v49, %s4355_s19  ;;  %2281 = vmatpush1.bf16.msra.mxu1 %v3275_v63  ;;  %v672_v16 = vsel %vm667_vm3, %v4302_v12, %v2573_v7  ;;  %v671_v18 = vsel %vm667_vm3, %v2573_v7, %v4299_v6 }
 0x1a1   : > { %v3292_v8 = vpop.permute.xlu1 %2576  ;;  %v3294_v11 = vpop.permute.xlu0 %2516 }
 0x1a2   : > { %v4297_v14 = vunpack.i.h.bf16 %v3292_v8  ;;  %v2578_v15 = vunpack.i.l.bf16 %v3292_v8  ;;  %v4300_v30 = vunpack.i.h.bf16 %v3294_v11 }
 0x1a3   : > { %995 = vrot.lane.b32.xlu1 %v3191_v39, %s4355_s19 }
 0x1a4   : > { %v705_v17 = vsel %vm700_vm4, %v4308_v13, %v2578_v15  ;;  %2751 = vrot.lane.b32.xlu0 %v3231_v49, %s4356_s21  ;;  %v704_v20 = vsel %vm700_vm4, %v2578_v15, %v4297_v14 }
 0x1a5   : > { %v3322_v21 = vpack.c.bf16 %v705_v17, %v672_v16  ;;  %v3324_v22 = vpop.permute.xlu1 %2581  ;;  %v3326_v23 = vpop.permute.xlu0 %2521  ;;  %v3328_v24 = vpack.c.bf16 %v704_v20, %v671_v18 }
 0x1a6   : > { %v4293_v25 = vunpack.i.h.bf16 %v3324_v22  ;;  %v2583_v26 = vunpack.i.l.bf16 %v3324_v22  ;;  %v4301_v31 = vunpack.i.h.bf16 %v3326_v23 }
 0x1a7   : > { %1028 = vrot.lane.b32.xlu1 %v3191_v39, %s4356_s21  ;;  %2283 = vmatprep.subr.bf16.mxu1 %v3328_v24 }
 0x1a8   : > { %2756 = vrot.lane.b32.xlu0 %v3231_v49, %s2894_s18  ;;  %2285 = vmatpush1.bf16.msra.mxu1 %v3322_v21  ;;  %v738_v35 = vsel %vm733_vm5, %v4300_v30, %v2583_v26  ;;  %v737_v37 = vsel %vm733_vm5, %v2583_v26, %v4293_v25 }
 0x1a9   : > { %v3338_v27 = vpop.permute.xlu1 %2586  ;;  %v3340_v28 = vpop.permute.xlu0 %2526 }
 0x1aa   : > { %v4292_v32 = vunpack.i.h.bf16 %v3338_v27  ;;  %v2588_v33 = vunpack.i.l.bf16 %v3338_v27  ;;  %v4294_v16 = vunpack.i.h.bf16 %v3340_v28 }
 0x1ab   : > { %1061 = vrot.lane.b32.xlu1 %v3191_v39, %s2894_s18  ;;  %s4357_s18 = smov 47  }
 0x1ac   : > { %v771_v36 = vsel %vm766_vm6, %v4301_v31, %v2588_v33  ;;  %2761 = vrot.lane.b32.xlu0 %v3231_v49, %s2895_s9  ;;  %v770_v40 = vsel %vm766_vm6, %v2588_v33, %v4292_v32 }
 0x1ad   : > { %v3368_v46 = vpack.c.bf16 %v771_v36, %v738_v35  ;;  %v3370_v53 = vpop.permute.xlu1 %2591  ;;  %v3372_v55 = vpop.permute.xlu0 %2531  ;;  %v3374_v60 = vpack.c.bf16 %v770_v40, %v737_v37 }
 0x1ae   : > { %v4291_v61 = vunpack.i.h.bf16 %v3370_v53  ;;  %v2593_v62 = vunpack.i.l.bf16 %v3370_v53  ;;  %v4295_v17 = vunpack.i.h.bf16 %v3372_v55 }
 0x1af   : > { %1094 = vrot.lane.b32.xlu1 %v3191_v39, %s2895_s9  ;;  %2287 = vmatprep.subr.bf16.mxu1 %v3374_v60  ;;  %s4358_s9 = smov 46  }
 0x1b0   : > { %2766 = vrot.lane.b32.xlu0 %v3231_v49, %s4357_s18  ;;  %2289 = vmatpush1.bf16.msra.mxu1 %v3368_v46  ;;  %v804_v26 = vsel %vm799_vm7, %v4294_v16, %v2593_v62  ;;  %v803_v35 = vsel %vm799_vm7, %v2593_v62, %v4291_v61 }
 0x1b1   : > { %v3384_v7 = vpop.permute.xlu1 %2596  ;;  %v3386_v15 = vpop.permute.xlu0 %851 }
 0x1b2   : > { %v4290_v18 = vunpack.i.h.bf16 %v3384_v7  ;;  %v2598_v20 = vunpack.i.l.bf16 %v3384_v7 }
 0x1b3   : > { %1127 = vrot.lane.b32.xlu1 %v3191_v39, %s4357_s18 }
 0x1b4   : > { %v837_v33 = vsel %vm832_vm8, %v4295_v17, %v2598_v20  ;;  %2771 = vrot.lane.b32.xlu0 %v3231_v49, %s4358_s9  ;;  %v836_v36 = vsel %vm832_vm8, %v2598_v20, %v4290_v18 }
 0x1b5   : > { %v3414_v37 = vpack.c.bf16 %v837_v33, %v804_v26  ;;  %v3416_v40 = vpop.permute.xlu1 %857  ;;  %v856_v0 = vpop.permute.xlu0 %855  ;;  %v3421_v49 = vpack.c.bf16 %v836_v36, %v803_v35 }
 0x1b6   : > { %v3444_v36 = vsel %vm865_vm10, %v3204_v41, %v856_v0 }
 0x1b7   : > { %1160 = vrot.lane.b32.xlu1 %v3191_v39, %s4358_s9  ;;  %2291 = vmatprep.subr.bf16.mxu1 %v3421_v49 }
 0x1b8   : > { %1472 = vperm.xlu0 %2499, %v1469_v59   ;;  %2293 = vmatpush1.bf16.msra.mxu1 %v3414_v37  ;;  %v3439_v59 = vsel %vm865_vm10, %v856_v0, %v3416_v40 }
 0x1b9   : > { %v3427_v62 = vpop.permute.xlu1 %2601  ;;  %v3430_v20 = vpop.permute.xlu0 %2536 }
 0x1ba   : > { %4359 = vst [vmem:[#allocation13_spill] sm:$0xff] %v3427_v62  ;;  %v4298_v26 = vunpack.i.h.bf16 %v3427_v62  ;;  %v2603_v33 = vunpack.i.l.bf16 %v3427_v62  ;;  %v4296_v35 = vunpack.i.h.bf16 %v3430_v20 }
 0x1bc   : > { %v903_v18 = vsel %vm898_vm9, %v4296_v35, %v2603_v33  ;;  %v902_v61 = vsel %vm898_vm9, %v2603_v33, %v4298_v26  ;;  %2073 = vrot.lane.b32.xlu0 %v3061_v4, %s4356_s21 }
 0x1bd   : > { %v2296_v32 = vpack.c.bf16 %v903_v18, %v3444_v36  ;;  %v3457_v25 = vpop.permute.xlu1 %2606  ;;  %v3459_v16 = vpop.permute.xlu0 %2541  ;;  %v2294_v0 = vpack.c.bf16 %v902_v61, %v3439_v59 }
 0x1be   : > { %4360 = vst [vmem:[#allocation14_spill] sm:$0xff] %v3457_v25  ;;  %v4306_v17 = vunpack.i.h.bf16 %v3457_v25  ;;  %v2608_v35 = vunpack.i.l.bf16 %v3457_v25  ;;  %v4303_v14 = vunpack.i.h.bf16 %v3459_v16  ;;  %v2513_v25 = vunpack.i.l.bf16 %v3279_v2 }
 0x1bf   : > { %2295 = vmatprep.subr.bf16.mxu1 %v2294_v0 }
 0x1c0   : > { %2297 = vmatpush1.bf16.msra.mxu1 %v2296_v32  ;;  %2077 = vrot.lane.b32.xlu0 %v3064_v5, %s4356_s21  ;;  %v936_v32 = vsel %vm931_vm11, %v4303_v14, %v2608_v35  ;;  %v935_v5 = vsel %vm931_vm11, %v2608_v35, %v4306_v17 }
 0x1c1   : > { %v3466_v33 = vpop.permute.xlu1 %2611  ;;  %v3469_v4 = vpop.permute.xlu0 %2546 }
 0x1c2   : > { %4361 = vst [vmem:[#allocation15_spill] sm:$0xff] %v3466_v33  ;;  %v4307_v61 = vunpack.i.h.bf16 %v3466_v33  ;;  %v2613_v18 = vunpack.i.l.bf16 %v3466_v33  ;;  %v4304_v0 = vunpack.i.h.bf16 %v3469_v4 }
 0x1c4   : > { %v969_v26 = vsel %vm4338_vm12, %v4304_v0, %v2613_v18  ;;  %v968_v6 = vsel %vm4338_vm12, %v2613_v18, %v4307_v61  ;;  %2081 = vrot.lane.b32.xlu0 %v3074_v9, %s4356_s21 }
 0x1c5   : > { %v2300_v30 = vpack.c.bf16 %v969_v26, %v936_v32  ;;  %v3492_v31 = vpop.permute.xlu1 %2616  ;;  %v3494_v12 = vpop.permute.xlu0 %2551  ;;  %v2298_v14 = vpack.c.bf16 %v968_v6, %v935_v5 }
 0x1c6   : > { %4362 = vst [vmem:[#allocation16_spill] sm:$0xff] %v3492_v31  ;;  %v4313_v0 = vunpack.i.h.bf16 %v3492_v31  ;;  %v2618_v54 = vunpack.i.l.bf16 %v3492_v31  ;;  %v4309_v35 = vunpack.i.h.bf16 %v3494_v12 }
 0x1c7   : > { %2299 = vmatprep.subr.bf16.mxu1 %v2298_v14 }
 0x1c8   : > { %2301 = vmatpush1.bf16.msra.mxu1 %v2300_v30  ;;  %2085 = vrot.lane.b32.xlu0 %v3079_v10, %s4356_s21  ;;  %v1002_v30 = vsel %vm997_vm13, %v4309_v35, %v2618_v54  ;;  %v1001_v10 = vsel %vm997_vm13, %v2618_v54, %v4313_v0  ;;  %v2523_v0 = vunpack.i.l.bf16 %v3326_v23 }
 0x1c9   : > { %v3502_v18 = vpop.permute.xlu1 %2621  ;;  %v3505_v26 = vpop.permute.xlu0 %2556 }
 0x1ca   : > { %4363 = vst [vmem:[#allocation17_spill] sm:$0xff] %v3502_v18  ;;  %v4314_v9 = vunpack.i.h.bf16 %v3502_v18  ;;  %v2623_v6 = vunpack.i.l.bf16 %v3502_v18  ;;  %v4311_v14 = vunpack.i.h.bf16 %v3505_v26  ;;  %v4367_v18 = vunpack.i.h.bf16 %v3256_v57 }
 0x1cc   : > { %v1035_v32 = vsel %vm4339_vm14, %v4311_v14, %v2623_v6  ;;  %v1034_v5 = vsel %vm4339_vm14, %v2623_v6, %v4314_v9  ;;  %v2508_v14 = vunpack.i.l.bf16 %v3256_v57  ;;  %v4369_v57 = vunpack.i.h.bf16 %v3326_v23 }
 0x1cd   : > { %v2304_v17 = vpack.c.bf16 %v1035_v32, %v1002_v30  ;;  %v3528_v61 = vpop.permute.xlu1 %2626  ;;  %v3530_v13 = vpop.permute.xlu0 %2561  ;;  %v2302_v35 = vpack.c.bf16 %v1034_v5, %v1001_v10  ;;  %v4365_v30 = vunpack.i.h.bf16 %v3279_v2  ;;  %v2518_v10 = vunpack.i.l.bf16 %v3294_v11 }
 0x1ce   : > { %4364 = vst [vmem:[#allocation18_spill] sm:$0xff] %v3528_v61  ;;  %v673_v2 = vsel %vm667_vm3, %v2508_v14, %v4367_v18  ;;  %v772_v18 = vsel %vm766_vm6, %v2523_v0, %v4369_v57  ;;  %v4373_v9 = vunpack.i.h.bf16 %v3277_v1  ;;  %v2538_v1 = vunpack.i.l.bf16 %v3430_v20 }
 0x1cf   : > { %2303 = vmatprep.subr.bf16.mxu1 %v2302_v35  ;;  %v706_v32 = vsel %vm700_vm4, %v2513_v25, %v4365_v30  ;;  %v4366_v35 = vunpack.i.l.bf16 %v3241_v52 }
 0x1d0   : > { %2305 = vmatpush1.bf16.msra.mxu1 %v2304_v17  ;;  %v3564_v62 = vpack.c.bf16 %v706_v32, %v673_v2  ;;  %v4370_v32 = vunpack.i.h.bf16 %v3294_v11 }
 0x1d1   : > { %v3534_v31 = vpop.permute.xlu1 %2631  ;;  %v3536_v54 = vpop.permute.xlu0 %2636 }
 0x1d2   : > { %v4318_v6 = vunpack.i.l.bf16 %v3534_v31  ;;  %v739_v2 = vsel %vm733_vm5, %v2518_v10, %v4370_v32 }
 0x1d4   : > { %v641_v17 = vsel %vm634_vm2, %v4318_v6, %v4366_v35  ;;  %v2533_v35 = vunpack.i.l.bf16 %v3372_v55  ;;  %v4371_v6 = vunpack.i.l.bf16 %v3536_v54 }
 0x1d5   : > { %v3558_v30 = vpack.c.bf16 %v641_v17, %v3094_v19  ;;  %v3560_v33 = vpop.permute.xlu1 %2641  ;;  %v3562_v52 = vpop.permute.xlu0 %2646  ;;  %v2528_v19 = vunpack.i.l.bf16 %v3340_v28  ;;  %v4372_v17 = vunpack.i.h.bf16 %v3536_v54 }
 0x1d6   : > { %v4322_v5 = vunpack.i.l.bf16 %v3560_v33  ;;  %v674_v23 = vsel %vm667_vm3, %v4371_v6, %v2508_v14  ;;  %v4374_v32 = vunpack.i.h.bf16 %v3560_v33 }
 0x1d7   : > { %4368 = vst [vmem:[#allocation19_spill] sm:$0xff] %v3558_v30  ;;  %2229 = vmatpush1.bf16.msra.mxu0 %v3558_v30  ;;  %v670_v11 = vsel %vm667_vm3, %v4373_v9, %v4372_v17  ;;  %v4375_v30 = vunpack.i.h.bf16 %v3292_v8  ;;  %v4377_v8 = vunpack.i.h.bf16 %v3372_v55  ;;  %v4381_v55 = vunpack.i.h.bf16 %v3324_v22 }
 0x1d8   : > { %v707_v57 = vsel %vm700_vm4, %v4322_v5, %v2513_v25  ;;  %2231 = vmatprep.subr.bf16.mxu0 %v3564_v62  ;;  %v3608_v5 = vpack.c.bf16 %v772_v18, %v739_v2  ;;  %v4379_v2 = vunpack.i.h.bf16 %v3340_v28  ;;  %v4382_v28 = vunpack.i.h.bf16 %v3338_v27 }
 0x1d9   : > { %v703_v14 = vsel %vm700_vm4, %v4375_v30, %v4374_v32  ;;  %v3602_v6 = vpack.c.bf16 %v707_v57, %v674_v23  ;;  %v3604_v43 = vpop.permute.xlu1 %2651  ;;  %v3606_v25 = vpop.permute.xlu0 %2656  ;;  %v838_v30 = vsel %vm832_vm8, %v2533_v35, %v4377_v8  ;;  %v4378_v23 = vunpack.i.l.bf16 %v3562_v52 }
 0x1da   : > { %v3610_v34 = vpack.c.bf16 %v703_v14, %v670_v11  ;;  %v4325_v9 = vunpack.i.h.bf16 %v3604_v43  ;;  %v4324_v17 = vunpack.i.l.bf16 %v3604_v43  ;;  %v805_v57 = vsel %vm799_vm7, %v2528_v19, %v4379_v2 }
 0x1db   : > { %4376 = vst [vmem:[#allocation20_spill] sm:$0xff] %v3602_v6  ;;  %v740_v18 = vsel %vm733_vm5, %v4378_v23, %v2518_v10  ;;  %2233 = vmatpush1.bf16.msra.mxu0 %v3602_v6  ;;  %v4380_v11 = vunpack.i.h.bf16 %v3562_v52  ;;  %v4328_v10 = vunpack.i.h.bf16 %v3606_v25  ;;  %v4327_v8 = vunpack.i.l.bf16 %v3606_v25 }
 0x1dc   : > { %v773_v14 = vsel %vm766_vm6, %v4324_v17, %v2523_v0  ;;  %2235 = vmatprep.subr.bf16.mxu0 %v3608_v5  ;;  %v769_v22 = vsel %vm766_vm6, %v4382_v28, %v4325_v9  ;;  %v3652_v23 = vsel %vm865_vm10, %v3386_v15, %v3204_v41  ;;  %v905_v27 = vsel %vm898_vm9, %v3219_v44, %v2538_v1 }
 0x1dd   : > { %v736_v32 = vsel %vm733_vm5, %v4381_v55, %v4380_v11  ;;  %v3654_v0 = vpack.c.bf16 %v773_v14, %v740_v18  ;;  %v3656_v2 = vpop.permute.xlu1 %2666  ;;  %v3658_v11 = vpop.permute.xlu0 %2661  ;;  %v3660_v55 = vpack.c.bf16 %v838_v30, %v805_v57  ;;  %v4384_v41 = vunpack.i.h.bf16 %v3430_v20 }
 0x1de   : > { %v3662_v17 = vpack.c.bf16 %v769_v22, %v736_v32  ;;  %v4329_v28 = vunpack.i.h.bf16 %v3656_v2  ;;  %v4326_v9 = vunpack.i.l.bf16 %v3656_v2  ;;  %v2548_v14 = vunpack.i.l.bf16 %v3469_v4 }
 0x1df   : > { %4383 = vst [vmem:[#allocation21_spill] sm:$0xff] %v3654_v0  ;;  %v904_v18 = vsel %vm898_vm9, %v2538_v1, %v4384_v41  ;;  %v2628_v57 = vunpack.i.l.bf16 %v3528_v61  ;;  %2237 = vmatpush1.bf16.msra.mxu0 %v3654_v0  ;;  %v806_v22 = vsel %vm799_vm7, %v4327_v8, %v2528_v19  ;;  %v4385_v1 = vunpack.i.h.bf16 %v3370_v53 }
 0x1e0   : > { %v839_v20 = vsel %vm832_vm8, %v4326_v9, %v2533_v35  ;;  %2239 = vmatprep.subr.bf16.mxu0 %v3660_v55  ;;  %v4386_v30 = vunpack.i.h.bf16 %v3384_v7  ;;  %v3703_v35 = vsel %vm865_vm10, %v3206_v42, %v3386_v15  ;;  %v2543_v9 = vunpack.i.l.bf16 %v3459_v16 }
 0x1e1   : > { %v802_v41 = vsel %vm799_vm7, %v4385_v1, %v4328_v10  ;;  %4387 = vst [vmem:[#allocation22_spill] sm:$0xff] %v3703_v35  ;;  %v3706_v8 = vpack.c.bf16 %v839_v20, %v806_v22  ;;  %v3708_v53 = vpop.permute.xlu1 %2671  ;;  %v3710_v1 = vpop.permute.xlu0 %1047  ;;  %v2664_v7 = vunpack.i.h.bf16 %v3658_v11  ;;  %v2242_v32 = vpack.c.bf16 %v904_v18, %v3652_v23 }
 0x1e2   : > { %v835_v19 = vsel %vm832_vm8, %v4386_v30, %v4329_v28  ;;  %v2673_v28 = vunpack.i.l.bf16 %v3708_v53  ;;  %v2244_v15 = vpack.c.bf16 %v905_v27, %v3703_v35  ;;  %v2558_v0 = vunpack.i.l.bf16 %v3505_v26 }
 0x1e3   : > { %4388 = vst [vmem:[#allocation23_spill] sm:$0xff] %v3706_v8  ;;  %v3712_v10 = vpack.c.bf16 %v835_v19, %v802_v41  ;;  %2241 = vmatpush1.bf16.msra.mxu0 %v3706_v8  ;;  %v4389_v22 = vunpack.i.h.bf16 %v3469_v4  ;;  %v4390_v41 = vunpack.i.h.bf16 %v3530_v13  ;;  %v4391_v27 = vunpack.i.h.bf16 %v3528_v61 }
 0x1e4   : > { %v1101_v18 = vsel %vm1096_vm0, %v2664_v7, %v2673_v28  ;;  %2243 = vmatprep.subr.bf16.mxu0 %v2242_v32  ;;  %v4392_v35 = vunpack.i.h.bf16 %v3708_v53  ;;  %v4393_v44 = vunpack.i.h.bf16 %v3459_v16  ;;  %v2663_v61 = vunpack.i.l.bf16 %v3658_v11 }
 0x1e5   : > { %v970_v20 = vsel %vm4338_vm12, %v2548_v14, %v4389_v22  ;;  %v1068_v19 = vsel %vm1063_vm15, %v4390_v41, %v2628_v57  ;;  %v1067_v30 = vsel %vm1063_vm15, %v2628_v57, %v4391_v27  ;;  %v2553_v22 = vunpack.i.l.bf16 %v3494_v12  ;;  %v3741_v6 = vpop.permute.xlu1 %1080  ;;  %v2677_v41 = vpop.permute.xlu0 %2676 }
 0x1e6   : > { %v1100_v4 = vsel %vm1096_vm0, %v2673_v28, %v4392_v35  ;;  %v2308_v8 = vpack.c.bf16 %v1101_v18, %v1068_v19  ;;  %v937_v32 = vsel %vm931_vm11, %v2543_v9, %v4393_v44  ;;  %v971_v57 = vsel %vm4338_vm12, %v3225_v47, %v2548_v14 }
 0x1e7   : > { %v2306_v42 = vpack.c.bf16 %v1100_v4, %v1067_v30  ;;  %v2246_v27 = vpack.c.bf16 %v970_v20, %v937_v32  ;;  %2245 = vmatpush1.bf16.msra.mxu0 %v2244_v15  ;;  %v4394_v28 = vunpack.i.h.bf16 %v3505_v26  ;;  %v938_v16 = vsel %vm931_vm11, %v3221_v45, %v2543_v9 }
 0x1e8   : > { %v2248_v44 = vpack.c.bf16 %v971_v57, %v938_v16  ;;  %v2563_v30 = vunpack.i.l.bf16 %v3530_v13  ;;  %v4395_v11 = vunpack.i.h.bf16 %v3494_v12  ;;  %v1037_v26 = vsel %vm4339_vm14, %v3239_v51, %v2558_v0 }
 0x1e9   : > { %2307 = vmatprep.subr.bf16.mxu1 %v2306_v42  ;;  %v1036_v35 = vsel %vm4339_vm14, %v2558_v0, %v4394_v28  ;;  %2247 = vmatprep.subr.bf16.mxu0 %v2246_v27  ;;  %v3759_v14 = vpop.permute.xlu1 %2681  ;;  %v2687_v20 = vpop.permute.xlu0 %2686  ;;  %vm1129_vm12 = vcmp.lt.s32.totalorder %v3233_v50, 47  ;;  %v1102_v18 = vsel %vm1096_vm0, %v2663_v61, %v2664_v7  ;;  %v1004_v12 = vsel %vm997_vm13, %v3227_v48, %v2553_v22 }
 0x1ea   : > { %2309 = vmatpush1.bf16.msra.mxu1 %v2308_v8  ;;  %v1003_v42 = vsel %vm997_vm13, %v2553_v22, %v4395_v11  ;;  %v2634_v8 = vunpack.i.h.bf16 %v3534_v31  ;;  %v2689_v15 = vunpack.i.h.bf16 %v2687_v20  ;;  %v2688_v19 = vunpack.i.l.bf16 %v2687_v20 }
 0x1eb   : > { %v2250_v9 = vpack.c.bf16 %v1036_v35, %v1003_v42  ;;  %2249 = vmatpush1.bf16.msra.mxu0 %v2248_v44  ;;  %v2684_v4 = vunpack.i.h.bf16 %v3759_v14  ;;  %v2683_v32 = vunpack.i.l.bf16 %v3759_v14  ;;  %vm1162_vm14 = vcmp.lt.s32.totalorder %v3233_v50, 46 }
 0x1ec   : > { %v2252_v0 = vpack.c.bf16 %v1037_v26, %v1004_v12  ;;  %v2679_v57 = vunpack.i.h.bf16 %v2677_v41  ;;  %v2678_v27 = vunpack.i.l.bf16 %v2677_v41  ;;  %v4396_v7 = vunpack.i.h.bf16 %v3530_v13 }
 0x1ed   : > { %2251 = vmatprep.subr.bf16.mxu0 %v2250_v9  ;;  %v3778_v28 = vpop.permute.xlu1 %2691  ;;  %v3780_v35 = vpop.permute.xlu0 %1113  ;;  %v1103_v22 = vsel %vm1096_vm0, %v3741_v6, %v2663_v61  ;;  %v1070_v41 = vsel %vm1063_vm15, %v3710_v1, %v2563_v30  ;;  %v1168_v13 = vsel %vm1162_vm14, %v2688_v19, %v2689_v15  ;;  %v4397_v42 = vunpack.i.h.bf16 %v3254_v56 }
 0x1ee   : > { %v1069_v16 = vsel %vm1063_vm15, %v2563_v30, %v4396_v7  ;;  %v2694_v44 = vunpack.i.h.bf16 %v3778_v28  ;;  %v2693_v20 = vunpack.i.l.bf16 %v3778_v28  ;;  %v1134_v26 = vsel %vm1129_vm12, %v2679_v57, %v2683_v32 }
 0x1ef   : > { %v2254_v11 = vpack.c.bf16 %v1102_v18, %v1069_v16  ;;  %2253 = vmatpush1.bf16.msra.mxu0 %v2252_v0  ;;  %v637_v61 = vsel %vm634_vm2, %v4397_v42, %v2634_v8  ;;  %v1133_v30 = vsel %vm1129_vm12, %v2683_v32, %v2684_v4  ;;  %v2256_v18 = vpack.c.bf16 %v1103_v22, %v1070_v41 }
 0x1f0   : > { %v1167_v9 = vsel %vm1162_vm14, %v2689_v15, %v2693_v20  ;;  %v1166_v56 = vsel %vm1162_vm14, %v2693_v20, %v2694_v44  ;;  %v1135_v15 = vsel %vm1129_vm12, %v2678_v27, %v2679_v57  ;;  %v3824_v42 = vpack.c.bf16 %v637_v61, %v3119_v29 }
 0x1f1   : > { %2255 = vmatprep.subr.bf16.mxu0 %v2254_v11  ;;  %v2312_v12 = vpack.c.bf16 %v1167_v9, %v1134_v26  ;;  %v3814_v0 = vpop.permute.xlu1 %1146  ;;  %v3816_v7 = vpop.permute.xlu0 %861  ;;  %v2310_v16 = vpack.c.bf16 %v1166_v56, %v1133_v30  ;;  %v2258_v32 = vpack.c.bf16 %v1168_v13, %v1135_v15  ;;  %v1136_v22 = vsel %vm1129_vm12, %v3780_v35, %v2678_v27 }
 0x1f2   : > { %v1169_v11 = vsel %vm1162_vm14, %v3814_v0, %v2688_v19  ;;  %v4400_v15 = vunpack.i.l.bf16 %v3560_v33 }
 0x1f3   : > { %2257 = vmatpush1.bf16.msra.mxu0 %v2256_v18  ;;  %2311 = vmatprep.subr.bf16.mxu1 %v2310_v16  ;;  %v2260_v20 = vpack.c.bf16 %v1169_v11, %v1136_v22  ;;  %v3880_v18 = vld [vmem:[%s4264_s3] sm:$0xff] }
 0x1f4   : > { %2259 = vmatprep.subr.bf16.mxu0 %v2258_v32  ;;  %2313 = vmatpush1.bf16.msra.mxu1 %v2312_v12  ;;  %v4399_v12 = vunpack.i.l.bf16 %v3536_v54 }
 0x1f5   : > { %v3829_v41 = vpop.permute.xlu1 %859  ;;  %v2697_v57 = vpop.permute.xlu0 %2696  ;;  %2315 = vmatprep.subr.bf16.mxu1 %v3824_v42 }
 0x1f7   : > { %2261 = vmatpush1.bf16.msra.mxu0 %v2260_v20 }
 0x1f8   : > { %2263 = vmatprep.subr.bf16.mxu0 %v3275_v63  ;;  %2317 = vmatpush1.bf16.msra.mxu1 %v3282_v3  ;;  %v2699_v63 = vunpack.i.h.bf16 %v2697_v57  ;;  %v2698_v3 = vunpack.i.l.bf16 %v2697_v57 }
 0x1f9   : > { %v2707_v19 = vpop.permute.xlu1 %2706  ;;  %v2702_v29 = vpop.permute.xlu0 %2701  ;;  %2319 = vmatprep.subr.bf16.mxu1 %v3610_v34 }
 0x1fa   : > { %v2708_v26 = vunpack.i.l.bf16 %v2707_v19  ;;  %v2703_v9 = vunpack.i.l.bf16 %v2702_v29 }
 0x1fb   : > { %2265 = vmatpush1.bf16.msra.mxu0 %v3259_v58 }
 0x1fc   : > { %2267 = vmatprep.subr.bf16.mxu0 %v3322_v21  ;;  %2321 = vmatpush1.bf16.msra.mxu1 %v3328_v24  ;;  %v2709_v21 = vunpack.i.h.bf16 %v2707_v19  ;;  %v2704_v24 = vunpack.i.h.bf16 %v2702_v29  ;;  %v4402_v29 = vunpack.i.h.bf16 %v3560_v33  ;;  %v4404_v33 = vunpack.i.l.bf16 %v3562_v52 }
 0x1fd   : > { %v3838_v27 = vpop.permute.xlu1 %2716  ;;  %v3840_v13 = vpop.permute.xlu0 %2711  ;;  %2323 = vmatprep.subr.bf16.mxu1 %v3662_v17 }
 0x1fe   : > { %v675_v16 = vsel %vm667_vm3, %v2704_v24, %v4399_v12  ;;  %v701_v11 = vsel %vm700_vm4, %v2708_v26, %v2709_v21  ;;  %v668_v32 = vsel %vm667_vm3, %v2703_v9, %v2704_v24  ;;  %v2718_v20 = vunpack.i.l.bf16 %v3838_v27 }
 0x1ff   : > { %2269 = vmatpush1.bf16.msra.mxu0 %v3564_v62  ;;  %v635_v62 = vsel %vm634_vm2, %v2698_v3, %v2699_v63  ;;  %v2713_v57 = vunpack.i.l.bf16 %v3840_v13 }
 0x200   : > { %2271 = vmatprep.subr.bf16.mxu0 %v3368_v46  ;;  %2325 = vmatpush1.bf16.msra.mxu1 %v3374_v60  ;;  %v3860_v46 = vsel %vm865_vm10, %v3416_v40, %v3829_v41  ;;  %v4398_v60 = vunpack.i.l.bf16 %v3534_v31  ;;  %v2714_v40 = vunpack.i.h.bf16 %v3840_v13  ;;  %v708_v31 = vsel %vm700_vm4, %v2709_v21, %v4400_v15 }
 0x201   : > { %v3846_v61 = vpop.permute.xlu1 %2726  ;;  %v3848_v58 = vpop.permute.xlu0 %2721  ;;  %2327 = vmatprep.subr.bf16.mxu1 %v3712_v10  ;;  %v4405_v21 = vunpack.i.l.bf16 %v3604_v43 }
 0x202   : > { %v642_v30 = vsel %vm634_vm2, %v2699_v63, %v4398_v60  ;;  %v2724_v13 = vunpack.i.h.bf16 %v3848_v58  ;;  %v2723_v12 = vunpack.i.l.bf16 %v3848_v58 }
 0x203   : > { %2273 = vmatpush1.bf16.msra.mxu0 %v3608_v5  ;;  %v3899_v22 = vpack.c.bf16 %v642_v30, %v3191_v39  ;;  %v734_v30 = vsel %vm733_vm5, %v2713_v57, %v2714_v40 }
 0x204   : > { %2275 = vmatprep.subr.bf16.mxu0 %v3414_v37  ;;  %2329 = vmatpush1.bf16.msra.mxu1 %v3421_v49  ;;  %v636_v37 = vsel %vm634_vm2, %v2634_v8, %v2698_v3  ;;  %v2719_v49 = vunpack.i.h.bf16 %v3838_v27  ;;  %v3891_v8 = vpack.c.bf16 %v635_v62, %v3189_v38  ;;  %v4401_v38 = vunpack.i.h.bf16 %v3536_v54 }
 0x205   : > { %v3866_v56 = vpop.permute.xlu1 %863  ;;  %v3868_v5 = vpop.permute.xlu0 %2731  ;;  %1602 = vmatprep.subr.mxu1 %v3860_v46  ;;  %v2729_v54 = vunpack.i.h.bf16 %v3846_v61  ;;  %v741_v3 = vsel %vm733_vm5, %v2714_v40, %v4404_v33 }
 0x206   : > { %v669_v19 = vsel %vm667_vm3, %v4401_v38, %v2703_v9  ;;  %v774_v24 = vsel %vm766_vm6, %v2719_v49, %v4405_v21  ;;  %v3935_v9 = vpack.c.bf16 %v701_v11, %v668_v32  ;;  %v767_v60 = vsel %vm766_vm6, %v2718_v20, %v2719_v49 }
 0x207   : > { %2277 = vmatpush1.bf16.msra.mxu0 %v3660_v55  ;;  %v702_v55 = vsel %vm700_vm4, %v4402_v29, %v2708_v26  ;;  %v4406_v26 = vld [vmem:[#allocation11_spill] sm:$0xff]  ;;  %v3954_v15 = vpack.c.bf16 %v774_v24, %v741_v3  ;;  %v4407_v49 = vunpack.i.h.bf16 %v3562_v52  ;;  %v3976_v11 = vpack.c.bf16 %v767_v60, %v734_v30  ;;  %v4413_v3 = vld [vmem:[#allocation12_spill] sm:$0xff] }
 0x208   : > { %1531 = vmatprep.subr.mxu0 %v3444_v36  ;;  %1603 = vmatpush1.msra.mxu1 %v3439_v59  ;;  %v3917_v36 = vpack.c.bf16 %v708_v31, %v675_v16  ;;  %v4403_v59 = vld [vmem:[#allocation9_spill] sm:$0xff]  ;;  %v3939_v62 = vpack.c.bf16 %v702_v55, %v669_v19  ;;  %v4410_v31 = vunpack.i.l.bf16 %v3656_v2  ;;  %v4411_v38 = vunpack.i.h.bf16 %v3606_v25 }
 0x209   : > { %v897_v39 = vpop.permute.xlu1 %896  ;;  %v3913_v63 = vpop.permute.xlu0 %2736  ;;  %1615 = vmatmul.mubr.f32.vlgmr.msra.gmra.mrb[4].mxu1 %v3880_v18  ;;  %2383 = vmatprep.subr.bf16.mxu1 %v3899_v22  ;;  %v3920_v27 = vpack.c.bf16 %v636_v37, %v4403_v59  ;;  %v2728_v37 = vunpack.i.l.bf16 %v3846_v61  ;;  %v735_v40 = vsel %vm733_vm5, %v4407_v49, %v2713_v57  ;;  %v4408_v61 = vunpack.i.h.bf16 %v3604_v43 }
 0x20a   : > { %2385 = vmatpush1.bf16.msra.mxu1 %v3891_v8  ;;  %2214 = vmatprep.mubr.msk.f32.mxu1 %vm1475_vm1, %v4406_v26  ;;  %v840_v43 = vsel %vm832_vm8, %v2729_v54, %v4410_v31  ;;  %v801_v19 = vsel %vm799_vm7, %v4411_v38, %v2723_v12  ;;  %v2734_v29 = vunpack.i.h.bf16 %v3868_v5  ;;  %v2733_v55 = vunpack.i.l.bf16 %v3868_v5 }
 0x20b   : > { %1532 = vmatpush1.msra.mxu0 %v3652_v23  ;;  %2387 = vmatprep.subr.bf16.mxu1 %v3917_v36  ;;  %v768_v58 = vsel %vm766_vm6, %v4408_v61, %v2718_v20  ;;  %v833_v32 = vsel %vm832_vm8, %v2728_v37, %v2729_v54  ;;  %v800_v20 = vsel %vm799_vm7, %v2723_v12, %v2724_v13  ;;  %v4412_v54 = vunpack.i.h.bf16 %v3656_v2 }
 0x20c   : > { %1544 = vmatmul.mubr.f32.vlgmr.msra.gmra.mrb[4].mxu0 %v3880_v18  ;;  %2331 = vmatprep.subr.bf16.mxu0 %v3920_v27  ;;  %v3983_v57 = vpack.c.bf16 %v768_v58, %v735_v40  ;;  %v4005_v5 = vpack.c.bf16 %v833_v32, %v800_v20  ;;  %v899_v30 = vsel %vm898_vm9, %v2734_v29, %v897_v39  ;;  %vm4420_vm4 = vcmp.lt.s32.totalorder %v3233_v50, 55 }
 0x20d   : > { %v3949_v16 = vpop.permute.xlu1 %929  ;;  %v3951_v23 = vpop.permute.xlu0 %2741  ;;  %2333 = vmatpush1.bf16.msra.mxu0 %v3824_v42  ;;  %2213 = vmatprep.mubr.msk.f32.mxu0 %vm1475_vm1, %v4406_v26  ;;  %v4409_v42 = vunpack.i.l.bf16 %v3606_v25  ;;  %v906_v25 = vsel %vm898_vm9, %v897_v39, %v4413_v3  ;;  %v900_v49 = vsel %vm898_vm9, %v2733_v55, %v2734_v29  ;;  %v4028_v40 = vsel %vm865_vm10, %v3829_v41, %v3816_v7  ;;  %v4416_v39 = vld [vmem:[#allocation13_spill] sm:$0xff]  ;;  %vm4426_vm6 = vmmov %vm4420_vm4 }
 0x20e   : > { %2335 = vmatprep.subr.bf16.mxu0 %v3939_v62  ;;  %2389 = vmatpush1.bf16.msra.mxu1 %v3935_v9  ;;  %v2744_v24 = vunpack.i.h.bf16 %v3951_v23  ;;  %v2743_v26 = vunpack.i.l.bf16 %v3951_v23  ;;  %vm4415_vm1 = vcmp.lt.s32.totalorder %v3233_v50, 62  ;;  %v4417_v58 = vunpack.i.h.bf16 %v4416_v39 }
 0x20f   : > { %v807_v52 = vsel %vm799_vm7, %v2724_v13, %v4409_v42  ;;  %2391 = vmatprep.subr.bf16.mxu1 %v3954_v15  ;;  %v834_v13 = vsel %vm832_vm8, %v4412_v54, %v2728_v37  ;;  %v2739_v42 = vunpack.i.h.bf16 %v3913_v63  ;;  %v939_v31 = vsel %vm931_vm11, %v3949_v16, %v3221_v45  ;;  %vm4418_vm2 = vmmov %vm4415_vm1 }
 0x210   : > { %v3992_v33 = vpack.c.bf16 %v840_v43, %v807_v52  ;;  %v4016_v60 = vpack.c.bf16 %v834_v13, %v801_v19  ;;  %v901_v41 = vsel %vm898_vm9, %v4417_v58, %v2733_v55  ;;  %vm4419_vm3 = vmmov %vm4415_vm1  ;;  %v4421_v13 = vld [vmem:[#allocation15_spill] sm:$0xff] }
 0x211   : > { %v963_v59 = vpop.permute.xlu1 %962  ;;  %2337 = vmatpush1.bf16.msra.mxu0 %v3610_v34  ;;  %v4414_v34 = vld [vmem:[#allocation10_spill] sm:$0xff]  ;;  %v2348_v54 = vpack.c.bf16 %v901_v41, %v3860_v46  ;;  %v4422_v3 = vunpack.i.h.bf16 %v4421_v13  ;;  %vm4423_vm5 = vmmov %vm4415_vm1 }
 0x212   : > { %v4001_v21 = vpop.permute.xlu0 %2746  ;;  %2339 = vmatprep.subr.bf16.mxu0 %v3983_v57  ;;  %2393 = vmatpush1.bf16.msra.mxu1 %v3976_v11  ;;  %v4012_v2 = vsel %vm865_vm10, %v3866_v56, %v4414_v34  ;;  %v972_v23 = vsel %vm4415_vm1, %v963_v59, %v3225_v47  ;;  %v2738_v47 = vunpack.i.l.bf16 %v3913_v63  ;;  %v965_v43 = vsel %vm4419_vm3, %v2744_v24, %v963_v59  ;;  %v4424_v46 = vld [vmem:[#allocation14_spill] sm:$0xff]  ;;  %vm4427_vm7 = vmmov %vm4420_vm4 }
 0x213   : > { %2395 = vmatprep.subr.bf16.mxu1 %v3992_v33  ;;  %v2398_v37 = vpack.c.bf16 %v906_v25, %v4012_v2  ;;  %v2402_v32 = vpack.c.bf16 %v972_v23, %v939_v31  ;;  %v2749_v19 = vunpack.i.h.bf16 %v4001_v21  ;;  %v2748_v29 = vunpack.i.l.bf16 %v4001_v21  ;;  %vm4430_vm8 = vmmov %vm4420_vm4 }
 0x214   : > { %v932_v59 = vsel %vm931_vm11, %v2739_v42, %v3949_v16  ;;  %v933_v25 = vsel %vm931_vm11, %v2738_v47, %v2739_v42  ;;  %vm4451_vm1 = vmmov %vm4420_vm4 }
 0x215   : > { %v996_v12 = vpop.permute.xlu1 %995  ;;  %2341 = vmatpush1.bf16.msra.mxu0 %v3662_v17  ;;  %v4039_v17 = vsel %vm865_vm10, %v3816_v7, %v3866_v56  ;;  %v2346_v7 = vpack.c.bf16 %v900_v49, %v4028_v40  ;;  %v966_v56 = vsel %vm4418_vm2, %v2743_v26, %v2744_v24  ;;  %v2404_v21 = vpack.c.bf16 %v965_v43, %v932_v59  ;;  %vm4452_vm2 = vmmov %vm4451_vm1 }
 0x216   : > { %v2752_v61 = vpop.permute.xlu0 %2751  ;;  %2343 = vmatprep.subr.bf16.mxu0 %v4016_v60  ;;  %2397 = vmatpush1.bf16.msra.mxu1 %v4005_v5  ;;  %v2400_v52 = vpack.c.bf16 %v899_v30, %v4039_v17  ;;  %v2350_v34 = vpack.c.bf16 %v966_v56, %v933_v25  ;;  %v4425_v24 = vunpack.i.h.bf16 %v4424_v46  ;;  %v999_v39 = vsel %vm997_vm13, %v2748_v29, %v2749_v19  ;;  %vm4453_vm3 = vmmov %vm4451_vm1 }
 0x217   : > { %2399 = vmatprep.subr.bf16.mxu1 %v2398_v37  ;;  %v2754_v20 = vunpack.i.h.bf16 %v2752_v61  ;;  %v2753_v38 = vunpack.i.l.bf16 %v2752_v61  ;;  %v998_v61 = vsel %vm997_vm13, %v2749_v19, %v996_v12  ;;  %v4433_v25 = vunpack.i.h.bf16 %v3708_v53 }
 0x218   : > { %v934_v16 = vsel %vm931_vm11, %v4425_v24, %v2738_v47 }
 0x219   : > { %v1029_v63 = vpop.permute.xlu1 %1028  ;;  %2345 = vmatpush1.bf16.msra.mxu0 %v3712_v10  ;;  %v967_v10 = vsel %vm4423_vm5, %v4422_v3, %v2743_v26  ;;  %v1032_v49 = vsel %vm4427_vm7, %v2753_v38, %v2754_v20 }
 0x21a   : > { %v1038_v45 = vsel %vm4420_vm4, %v1029_v63, %v3239_v51  ;;  %v2757_v55 = vpop.permute.xlu0 %2756  ;;  %2347 = vmatprep.subr.bf16.mxu0 %v2346_v7  ;;  %2401 = vmatpush1.bf16.msra.mxu1 %v2400_v52  ;;  %v1005_v51 = vsel %vm997_vm13, %v996_v12, %v3227_v48  ;;  %v1031_v30 = vsel %vm4426_vm6, %v2754_v20, %v1029_v63  ;;  %v4428_v52 = vld [vmem:[#allocation17_spill] sm:$0xff] }
 0x21b   : > { %2403 = vmatprep.subr.bf16.mxu1 %v2402_v32  ;;  %v2406_v37 = vpack.c.bf16 %v1038_v45, %v1005_v51  ;;  %v2352_v23 = vpack.c.bf16 %v967_v10, %v934_v16  ;;  %v2759_v58 = vunpack.i.h.bf16 %v2757_v55  ;;  %v2758_v41 = vunpack.i.l.bf16 %v2757_v55  ;;  %v4431_v32 = vld [vmem:[#allocation16_spill] sm:$0xff] }
 0x21c   : > { %v4429_v31 = vunpack.i.h.bf16 %v4428_v52  ;;  %v2408_v56 = vpack.c.bf16 %v1031_v30, %v998_v61  ;;  %v2354_v43 = vpack.c.bf16 %v1032_v49, %v999_v39  ;;  %v4432_v12 = vunpack.i.h.bf16 %v4431_v32  ;;  %v4436_v52 = vld [vmem:[#allocation19_spill] sm:$0xff] }
 0x21d   : > { %v1062_v26 = vpop.permute.xlu1 %1061  ;;  %2349 = vmatpush1.bf16.msra.mxu0 %v2348_v54  ;;  %v1065_v10 = vsel %vm1063_vm15, %v2758_v41, %v2759_v58 }
 0x21e   : > { %v2762_v48 = vpop.permute.xlu0 %2761  ;;  %2351 = vmatprep.subr.bf16.mxu0 %v2350_v34  ;;  %2405 = vmatpush1.bf16.msra.mxu1 %v2404_v21  ;;  %v1033_v7 = vsel %vm4430_vm8, %v4429_v31, %v2753_v38  ;;  %v1000_v20 = vsel %vm997_vm13, %v4432_v12, %v2748_v29  ;;  %v1064_v63 = vsel %vm1063_vm15, %v2759_v58, %v1062_v26  ;;  %vm4447_vm13 = vmmov %vm4420_vm4 }
 0x21f   : > { %v2764_v42 = vunpack.i.h.bf16 %v2762_v48  ;;  %v2763_v47 = vunpack.i.l.bf16 %v2762_v48  ;;  %2407 = vmatprep.subr.bf16.mxu1 %v2406_v37  ;;  %v1071_v55 = vsel %vm1063_vm15, %v1062_v26, %v3710_v1  ;;  %v2356_v59 = vpack.c.bf16 %v1033_v7, %v1000_v20 }
 0x221   : > { %v1095_v19 = vpop.permute.xlu1 %1094  ;;  %2353 = vmatpush1.bf16.msra.mxu0 %v2352_v23  ;;  %v1098_v45 = vsel %vm1096_vm0, %v2763_v47, %v2764_v42  ;;  %v1099_v1 = vsel %vm1096_vm0, %v4433_v25, %v2763_v47 }
 0x222   : > { %v1097_v38 = vsel %vm1096_vm0, %v2764_v42, %v1095_v19  ;;  %v1104_v54 = vsel %vm1096_vm0, %v1095_v19, %v3741_v6  ;;  %v2767_v29 = vpop.permute.xlu0 %2766  ;;  %2355 = vmatprep.subr.bf16.mxu0 %v2354_v43  ;;  %2409 = vmatpush1.bf16.msra.mxu1 %v2408_v56  ;;  %v2358_v51 = vpack.c.bf16 %v1098_v45, %v1065_v10  ;;  %v4434_v6 = vld [vmem:[#allocation18_spill] sm:$0xff]  ;;  %v1771_v43 = vld [vmem:[%s4266_s5] sm:$0xff]  ;;  %vm4442_vm0 = vcmask 64512  }
 0x223   : > { %v2410_v13 = vpack.c.bf16 %v1104_v54, %v1071_v55  ;;  %v2412_v3 = vpack.c.bf16 %v1097_v38, %v1064_v63  ;;  %v2768_v21 = vunpack.i.l.bf16 %v2767_v29  ;;  %v2769_v34 = vunpack.i.h.bf16 %v2767_v29  ;;  %vm4443_vm9 = vmmov %vm4442_vm0 }
 0x224   : > { %v4435_v24 = vunpack.i.h.bf16 %v4434_v6  ;;  %vm4444_vm10 = vmmov %vm4442_vm0 }
 0x225   : > { %v1128_v46 = vpop.permute.xlu1 %1127  ;;  %2357 = vmatpush1.bf16.msra.mxu0 %v2356_v59  ;;  %2411 = vmatprep.subr.bf16.mxu1 %v2410_v13  ;;  %v1132_v49 = vsel %vm1129_vm12, %v2684_v4, %v2768_v21  ;;  %v1131_v39 = vsel %vm1129_vm12, %v2768_v21, %v2769_v34  ;;  %vm4445_vm11 = vmmov %vm4442_vm0 }
 0x226   : > { %v1066_v16 = vsel %vm1063_vm15, %v4435_v24, %v2758_v41  ;;  %v2772_v30 = vpop.permute.xlu0 %2771  ;;  %2359 = vmatprep.subr.bf16.mxu0 %v2358_v51  ;;  %2413 = vmatpush1.bf16.msra.mxu1 %v2412_v3  ;;  %v1130_v23 = vsel %vm1129_vm12, %v2769_v34, %v1128_v46  ;;  %v1137_v14 = vsel %vm1129_vm12, %v1128_v46, %v3780_v35  ;;  %v4437_v35 = vld [vmem:[#allocation20_spill] sm:$0xff]  ;;  %vm4446_vm12 = vmmov %vm4420_vm4 }
 0x227   : > { %v2360_v37 = vpack.c.bf16 %v1099_v1, %v1066_v16  ;;  %v2774_v26 = vunpack.i.h.bf16 %v2772_v30  ;;  %v2773_v53 = vunpack.i.l.bf16 %v2772_v30  ;;  %vm4449_vm15 = vmmov %vm4420_vm4 }
 0x229   : > { %v1165_v61 = vsel %vm1162_vm14, %v2694_v44, %v2773_v53  ;;  %v1161_v48 = vpop.permute.xlu1 %1160  ;;  %2361 = vmatpush1.bf16.msra.mxu0 %v2360_v37  ;;  %v1164_v58 = vsel %vm1162_vm14, %v2773_v53, %v2774_v26 }
 0x22a   : > { %v1163_v4 = vsel %vm1162_vm14, %v2774_v26, %v1161_v48  ;;  %v1170_v28 = vsel %vm1162_vm14, %v1161_v48, %v3814_v0  ;;  %v2362_v44 = vpack.c.bf16 %v1164_v58, %v1131_v39  ;;  %v2364_v41 = vpack.c.bf16 %v1165_v61, %v1132_v49  ;;  %v4438_v0 = vld [vmem:[#allocation21_spill] sm:$0xff]  ;;  %vm4448_vm14 = vmmov %vm4420_vm4 }
 0x22b   : > { %v2414_v42 = vpack.c.bf16 %v1170_v28, %v1137_v14  ;;  %v2416_v47 = vpack.c.bf16 %v1163_v4, %v1130_v23  ;;  %vm4454_vm4 = vmmov %vm4451_vm1 }
 0x22c   : > { %2363 = vmatprep.subr.bf16.mxu0 %v2362_v44 }
 0x22d   : > { %2365 = vmatpush1.bf16.msra.mxu0 %v2364_v41  ;;  %2415 = vmatprep.subr.bf16.mxu1 %v2414_v42 }
 0x22e   : > { %2367 = vmatprep.subr.bf16.mxu0 %v3891_v8  ;;  %2417 = vmatpush1.bf16.msra.mxu1 %v2416_v47  ;;  %v4439_v8 = vld [vmem:[#allocation23_spill] sm:$0xff] }
 0x22f   : > { %2419 = vmatprep.subr.bf16.mxu1 %v4436_v52 }
 0x231   : > { %2369 = vmatpush1.bf16.msra.mxu0 %v3920_v27  ;;  %v1772_v27 = vld [vmem:[%s4267_s6] sm:$0xff] }
 0x232   : > { %2371 = vmatprep.subr.bf16.mxu0 %v3935_v9  ;;  %2421 = vmatpush1.bf16.msra.mxu1 %v3899_v22  ;;  %v4440_v22 = vld [vmem:[#allocation22_spill] sm:$0xff] }
 0x233   : > { %2423 = vmatprep.subr.bf16.mxu1 %v4437_v35  ;;  %1775 = vperm.xlu1 %2775, %v1772_v27   ;;  %v2776_v9 = vld [vmem:[%s3050_s23 + $0x8] sm:$0xff] }
 0x235   : > { %2373 = vmatpush1.bf16.msra.mxu0 %v3939_v62  ;;  %v2777_v62 = vld [vmem:[%s3050_s23 + $0x18] sm:$0xff] }
 0x236   : > { %2375 = vmatprep.subr.bf16.mxu0 %v3976_v11  ;;  %2425 = vmatpush1.bf16.msra.mxu1 %v3917_v36  ;;  %v4441_v36 = vmov 0.0   ;;  %v2779_v11 = vld [vmem:[%s3050_s23 + $0x38] sm:$0xff] }
 0x237   : > { %2427 = vmatprep.subr.bf16.mxu1 %v4438_v0  ;;  %2075 = vrot.lane.b32.xlu1 %v2776_v9, %s4356_s21 }
 0x239   : > { %2377 = vmatpush1.bf16.msra.mxu0 %v3983_v57 }
 0x23a   : > { %2379 = vmatprep.subr.bf16.mxu0 %v4005_v5  ;;  %2429 = vmatpush1.bf16.msra.mxu1 %v3954_v15  ;;  %v2778_v15 = vld [vmem:[%s3050_s23 + $0x28] sm:$0xff]  ;;  %s4450_s23 = sshll.u32 %s3044_s8, 6 }
 0x23b   : > { %2431 = vmatprep.subr.bf16.mxu1 %v4439_v8  ;;  %2079 = vrot.lane.b32.xlu1 %v2777_v62, %s4356_s21  ;;  %s4194_s19 = scalar_lea.vmem [#allocation6], %s4450_s23 }
 0x23c   : > { %s2128_s18 = sshll.u32 %s4194_s19, 4  ;;  %s4216_s18 = int_to_ptr.vmem [resolvable:$true] %s2128_s18 }
 0x23d   : > { %2381 = vmatpush1.bf16.msra.mxu0 %v4016_v60  ;;  %s2810_s20 = scalar_lea.vmem %s4216_s18, 1024  ;;  %p2817_p7 = scmp.lt.s32.totalorder %s4216_s18, %s2815_s29 }
 0x23e   : > { %1673 = vmatprep.subr.mxu0 %v4039_v17  ;;  %2433 = vmatpush1.bf16.msra.mxu1 %v3992_v33  ;;  %p2811_p6 = scmp.ne.s32.totalorder %s4216_s18, %s2810_s20  ;;  %p2818_p10 = scmp.lt.s32.totalorder %s2816_s15, %s2810_s20 }
 0x23f   : > { %1744 = vmatprep.subr.mxu1 %v4440_v22  ;;  %2083 = vrot.lane.b32.xlu1 %v2778_v15, %s4356_s21 }
 0x240   : > { %p2812_p12 = pnand %p2811_p6, %p4455_p11  ;;  %p2819_p2 = por %p2818_p10, %p2817_p7 }
 0x241   : > { %1674 = vmatpush1.msra.mxu0 %v4028_v40 }
 0x242   : > { %1686 = vmatmul.mubr.f32.vlgmr.msra.gmra.mrb[6].mxu0 %v3880_v18  ;;  %1745 = vmatpush1.msra.mxu1 %v4012_v2  ;;  %p2813_p13 = pneg %p2812_p12 }
 0x243   : > { %1757 = vmatmul.mubr.f32.vlgmr.msra.gmra.mrb[6].mxu1 %v3880_v18  ;;  %1845 = vmatprep.mubr.f32.mxu0 %v4441_v36  ;;  %v1473_v18 = vpop.permute.xlu0 %1472 }
 0x244   : > { %1916 = vmatprep.mubr.f32.mxu1 %v4441_v36  ;;  %2087 = vrot.lane.b32.xlu1 %v2779_v11, %s4356_s21  ;;  %s2225_s21 = sshll.u32 %s2960_s28, 10  ;;  %s2114_s28 = scalar_lea.sflag [#allocation5], %s3044_s8 }
 0x245   : > { %s4214_s12 = scalar_lea.hbm %s4268_s7, %s2225_s21  ;;  %p2820_p4 = pnand %p2819_p2, %p2813_p13 }
 0x247   : > { %v2074_v25 = vpop.permute.xlu0 %2073 }
 0x24b   : > { %v2078_v21 = vpop.permute.xlu0 %2077 }
 0x24f   : > { %v2082_v46 = vpop.permute.xlu0 %2081 }
 0x253   : > { %v2086_v15 = vpop.permute.xlu0 %2085 }
 0x2b2   : > { %v1776_v1 = vpop.permute.xlu1 %1775 }
 0x2b6   : > { %v2076_v51 = vpop.permute.xlu1 %2075 }
 0x2b7   : > { %v2095_v39 = vsel %vm4448_vm14, %v2074_v25, %v2076_v51  ;;  %v2094_v4 = vsel %vm4449_vm15, %v2076_v51, %v2078_v21 }
 0x2ba   : > { %v2080_v6 = vpop.permute.xlu1 %2079 }
 0x2bb   : > { %v2093_v30 = vsel %vm4446_vm12, %v2078_v21, %v2080_v6  ;;  %v2092_v49 = vsel %vm4447_vm13, %v2080_v6, %v2082_v46 }
 0x2be   : > { %v2084_v52 = vpop.permute.xlu1 %2083 }
 0x2c2   : > { %v2088_v35 = vpop.permute.xlu1 %2087 }
 0x2dc   : > { %v1616_v57 = vpop.f32.mrb[4].mxu1 }
 0x2dd   : > { %v1617_v33 = vadd.f32 %v1616_v57, %v1473_v18  ;;  %v1618_v5 = vpop.f32.mrb[5].mxu1  ;;  %v2089_v57 = vsel %vm4451_vm1, %v2086_v15, %v2088_v35 }
 0x2de   : > { %v1619_v2 = vadd.f32 %v1618_v5, %v1473_v18 }
 0x2df   : > { %v1545_v60 = vpop.f32.mrb[4].mxu0  ;;  %v1765_v7 = vmax.f32 %v1617_v33, 0.0  ;;  %v2091_v33 = vsel %vm4452_vm2, %v2082_v46, %v2084_v52 }
 0x2e0   : > { %v1766_v40 = vmax.f32 %v1619_v2, 0.0  ;;  %v1546_v17 = vadd.f32 %v1545_v60, %v1473_v18  ;;  %v1547_v31 = vpop.f32.mrb[5].mxu0 }
 0x2e1   : > { %v1548_v56 = vadd.f32 %v1547_v31, %v1473_v18  ;;  %v2096_v31 = vsel %vm4454_vm4, %v2088_v35, %v2074_v25 }
 0x2e2   : > { %1852 = vmatprep.subr.mxu1 %v1766_v40  ;;  %v1763_v12 = vmax.f32 %v1546_v17, 0.0  ;;  %v2090_v17 = vsel %vm4453_vm3, %v2084_v52, %v2086_v15 }
 0x2e3   : > { %v1764_v32 = vmax.f32 %v1548_v56, 0.0  ;;  %1853 = vmatpush1.msra.mxu1 %v1765_v7 }
 0x2e4   : > { %2216 = vmatmul.mubr.msk.f32.vlgmr.msra.gmra.mrb[8].mxu1 %vm4442_vm0, %v1771_v43 }
 0x2e5   : > { %1781 = vmatprep.subr.mxu0 %v1764_v32  ;;  %2058 = vmatprep.mubr.f32.mxu1 %v4441_v36 }
 0x2e6   : > { %1782 = vmatpush1.msra.mxu0 %v1763_v12 }
 0x2e7   : > { %2215 = vmatmul.mubr.msk.f32.vlgmr.msra.gmra.mrb[8].mxu0 %vm4443_vm9, %v1771_v43 }
 0x2e8   : > { %1987 = vmatprep.mubr.f32.mxu0 %v4441_v36 }
 0x315   : > { %v1687_v20 = vpop.f32.mrb[6].mxu0 }
 0x316   : > { %v1688_v63 = vadd.f32 %v1687_v20, %v1473_v18  ;;  %v1689_v19 = vpop.f32.mrb[7].mxu0  ;;  %v1758_v45 = vpop.f32.mrb[6].mxu1 }
 0x317   : > { %v1690_v55 = vadd.f32 %v1689_v19, %v1473_v18  ;;  %v1759_v38 = vadd.f32 %v1758_v45, %v1473_v18  ;;  %v1760_v54 = vpop.f32.mrb[7].mxu1 }
 0x318   : > { %v1761_v29 = vadd.f32 %v1760_v54, %v1473_v18  ;;  %v1767_v13 = vmax.f32 %v1688_v63, 0.0 }
 0x319   : > { %v1768_v59 = vmax.f32 %v1690_v55, 0.0  ;;  %v1769_v10 = vmax.f32 %v1759_v38, 0.0 }
 0x31a   : > { %v1770_v3 = vmax.f32 %v1761_v29, 0.0 }
 0x31b   : > { %1923 = vmatprep.subr.mxu0 %v1768_v59 }
 0x31c   : > { %1924 = vmatpush1.msra.mxu0 %v1767_v13  ;;  %1994 = vmatprep.subr.mxu1 %v1770_v3 }
 0x31d   : > { %2217 = vmatmul.mubr.msk.f32.vlgmr.msra.gmra.mrb[10].mxu0 %vm4444_vm10, %v1771_v43  ;;  %1995 = vmatpush1.msra.mxu1 %v1769_v10 }
 0x31e   : > { %2218 = vmatmul.mubr.msk.f32.vlgmr.msra.gmra.mrb[10].mxu1 %vm4445_vm11, %v1771_v43 }
 0x3b7   : > { %v1918_v34 = vpop.f32.mrb[8].mxu1 }
 0x3b8   : > { %v1919_v24 = vadd.f32 %v1918_v34, %v1776_v1  ;;  %v1920_v16 = vpop.f32.mrb[9].mxu1 }
 0x3b9   : > { %v1921_v37 = vadd.f32 %v1920_v16, %v1776_v1 }
 0x3ba   : > { %v1847_v26 = vpop.f32.mrb[8].mxu0  ;;  %v2067_v53 = vmax.f32 %v1919_v24, 0.0 }
 0x3bb   : > { %v1848_v23 = vadd.f32 %v1847_v26, %v1776_v1  ;;  %v1849_v61 = vpop.f32.mrb[9].mxu0  ;;  %v2068_v48 = vmax.f32 %v1921_v37, 0.0 }
 0x3bc   : > { %v2099_v58 = vadd.f32 %v2093_v30, %v2067_v53  ;;  %v1850_v14 = vadd.f32 %v1849_v61, %v1776_v1 }
 0x3bd   : > { %v2065_v28 = vmax.f32 %v1848_v23, 0.0  ;;  %v2100_v44 = vadd.f32 %v2092_v49, %v2068_v48 }
 0x3be   : > { %2107 = vst [vmem:[%s4194_s19 + $0x10] sm:$0xff] %v2099_v58  ;;  %v2066_v41 = vmax.f32 %v1850_v14, 0.0 }
 0x3bf   : > { %v2097_v42 = vadd.f32 %v2095_v39, %v2065_v28  ;;  %2108 = vst [vmem:[%s4194_s19 + $0x18] sm:$0xff] %v2100_v44 }
 0x3c0   : > { %v2098_v47 = vadd.f32 %v2094_v4, %v2066_v41 }
 0x3c1   : > { %2105 = vst [vmem:[%s4194_s19] sm:$0xff] %v2097_v42 }
 0x3c2   : > { %2106 = vst [vmem:[%s4194_s19 + $0x8] sm:$0xff] %v2098_v47 }
 0x3f0   : > { %v1989_v0 = vpop.f32.mrb[10].mxu0 }
 0x3f1   : > { %v1990_v8 = vadd.f32 %v1989_v0, %v1776_v1  ;;  %v1991_v22 = vpop.f32.mrb[11].mxu0  ;;  %v2060_v36 = vpop.f32.mrb[10].mxu1 }
 0x3f2   : > { %v1992_v27 = vadd.f32 %v1991_v22, %v1776_v1  ;;  %v2061_v9 = vadd.f32 %v2060_v36, %v1776_v1  ;;  %v2062_v62 = vpop.f32.mrb[11].mxu1 }
 0x3f3   : > { %v2069_v11 = vmax.f32 %v1990_v8, 0.0  ;;  %v2063_v18 = vadd.f32 %v2062_v62, %v1776_v1 }
 0x3f4   : > { %v2070_v5 = vmax.f32 %v1992_v27, 0.0  ;;  %v2071_v2 = vmax.f32 %v2061_v9, 0.0 }
 0x3f5   : > { %v2101_v60 = vadd.f32 %v2091_v33, %v2069_v11  ;;  %v2072_v40 = vmax.f32 %v2063_v18, 0.0 }
 0x3f6   : > { %v2102_v7 = vadd.f32 %v2090_v17, %v2070_v5  ;;  %v2103_v56 = vadd.f32 %v2089_v57, %v2071_v2 }
 0x3f7   : > { %2109 = vst [vmem:[%s4194_s19 + $0x20] sm:$0xff] %v2101_v60  ;;  %v2104_v43 = vadd.f32 %v2096_v31, %v2072_v40 }
 0x3f8   : > { %2110 = vst [vmem:[%s4194_s19 + $0x28] sm:$0xff] %v2102_v7  ;;  %2111 = vst [vmem:[%s4194_s19 + $0x30] sm:$0xff] %v2103_v56 }
 0x3f9   : > { %2112 = vst [vmem:[%s4194_s19 + $0x38] sm:$0xff] %v2104_v43 }
 0x3fa   : > { %2823 = shalt.err (!%p2820_p4)
}
 0x3fb   : > { %s2824_s8 = scalar_lea.hbm %s4214_s12, 1024  ;;  %s2828_s23 = scalar_lea.hbm %s4268_s7, 2048 }
 0x3fc   : > { %p2825_p5 = scmp.ne.s32.totalorder %s4214_s12, %s2824_s8  ;;  %p2829_p0 = scmp.lt.u32.totalorder %s4214_s12, %s4268_s7 }
 0x3fd   : > { %p2830_p1 = scmp.lt.u32.totalorder %s2828_s23, %s2824_s8  ;;  %p2832_p6 = scmp.lt.u32.totalorder %s2824_s8, %s4214_s12 }
 0x3fe   : > { %p2826_p8 = pnand %p2825_p5, %p4455_p11 }
 0x3ff   : > { %p2831_p3 = por %p2830_p1, %p2829_p0 }
 0x400   : > { %p2827_p9 = pneg %p2826_p8 }
 0x401   : > { %p2833_p12 = por %p2832_p6, %p2831_p3 }
 0x403   : > { %p2834_p13 = pnand %p2833_p12, %p2827_p9 }
 0x405   : > { %2837 = shalt.err (!%p2834_p13)
}
 0x406   : > { %2436 = dma.vmem_to_hbm [thread:$0]  (%p4455_p11), %s4216_s18, 1024, %s4214_s12, %s2114_s28  }
 0x407 PF: > { %s2140_s9 = sand.u32 1, %s2864_s24   ;;  %p4456_p7 = scmp.ne.s32.totalorder %s4343_s14, 0 }
 0x408   : > { %p4457_p10 = scmp.ge.s32.totalorder %s2876_s27, 2  ;;  %s2141_s16 = scalar_lea.sflag [#allocation5], %s2140_s9 }
 0x40a   : > { %p2443_p2 = pnand %p4457_p10, %p4456_p7 }
 0x40c   : > { %2859 = dma.done.wait (!%p2443_p2), %s2141_s16, 1024  }
 0x40d   : > { %2861 = vsyncadd (!%p2443_p2), %s2141_s16, 4294966272  ;;  %p20_p4 = scmp.ge.s32.totalorder %s2964_s30, 4   ;;  %s4458_s24 = smov %s2868_s25 }
 0x40e   : > { %s4459_s25 = smov %s2872_s26  ;;  %s4460_s26 = smov %s2976_s10 }
 0x40f   : > { %s4461_s27 = smov %s2964_s30  ;;  %22 = sbr.rel (!%p20_p4) target bundleno = 5 (0x5), region = 93 }
 0x416   :  { %2146 = vsyncpa [#allocation4], 1 }
 0x417   :  { %2148 = vsyncpa [#allocation4 + $0x1], 1 }
 0x418   :  { %2149 = vsyncpa [#allocation5], 1 }
 0x419   :  { %2151 = vsyncpa [#allocation5 + $0x1], 1 }

</bundles_post_ra>
